<compile_context>
chip_gen: v7x
topology: tpu7x:2x2x1
jax: 0.10.0
libtpu: 0.0.40
codegen_flags: <defaults>
</compile_context>

<pallas_src>
import functools

import jax
import jax.numpy as jnp
from jax.experimental import pallas as pl
from jax.experimental.pallas import tpu as pltpu

IPAD = 8  # input feature dim (7) padded to 8 for aligned sublane slices


def _head_offsets(hidden):
    """Row offsets of the packed 128-lane head slab."""
    r_w1a = hidden              # w1_h rows [0:H), w1_act rows [H:H+IPAD)
    r_w2 = r_w1a + IPAD         # fc2 weight (128 rows, real 64x32)
    r_w3 = r_w2 + 128           # fc3 weight (128 rows, real 32x8)
    r_w4 = r_w3 + 128           # fc4 weight (128 rows, real 8xA)
    r_b = r_w4 + 128            # 4 bias rows (bf1..bf4)
    rows = ((r_b + 4 + 7) // 8) * 8
    return r_w1a, r_w2, r_w3, r_w4, r_b, rows


def critic_kernel(x_ref, act_ref, lstm_ref, head_ref, o_ref, *,
                  hidden, seq_len, batch, numactions):
    T, B, H = seq_len, batch, hidden
    H4, H8 = 4 * H, 8 * H
    f32 = jnp.float32
    r_w1a, r_w2, r_w3, r_w4, r_b, _ = _head_offsets(H)

    # --- static views into the packed LSTM slab (cheap row/lane slices) ---
    w_top = lstm_ref[0:H, :]                      # (H, 8H) = [whh0^T | wih1^T]
    whh1_t = lstm_ref[H:2 * H, 0:H4]              # (H, 4H)
    wih0_t = lstm_ref[H:H + IPAD, H4:H8]          # (IPAD, 4H), row 7 is zero pad
    b0 = lstm_ref[2 * H:2 * H + 1, 0:H4]          # (1, 4H)  = bih0 + bhh0
    b1 = lstm_ref[2 * H:2 * H + 1, H4:H8]         # (1, 4H)  = bih1 + bhh1

    # --- fc1 action branch: computed up front so it hides under the recurrence ---
    act_proj = (jnp.dot(act_ref[...], head_ref[r_w1a:r_w2, :],
                        preferred_element_type=f32)
                + head_ref[r_b:r_b + 1, :])                          # (B, 128)

    # --- hoisted layer-0 input projection: one MXU pass for all T steps ---
    xg0 = jnp.dot(x_ref[...], wih0_t, preferred_element_type=f32) + b0   # (T*B, 4H)

    b1b = jnp.broadcast_to(b1, (B, H4))           # hoisted broadcast

    def gate_update(gates, c):
        # Single whole-vreg sigmoid; g-gate columns were pre-scaled by 2 in the
        # wrapper so tanh(x) == 2*sigmoid(2x) - 1 comes out of the same launch.
        sg = jax.nn.sigmoid(gates)                # (B, 4H)
        i = sg[:, 0 * H:1 * H]
        f = sg[:, 1 * H:2 * H]
        g = 2.0 * sg[:, 2 * H:3 * H] - 1.0        # == tanh(pre-activation)
        o = sg[:, 3 * H:4 * H]
        c_new = f * c + i * g
        h_new = o * jnp.tanh(c_new)
        return h_new, c_new

    zeros = jnp.zeros((B, H), f32)
    h0 = c0 = h1 = c1 = zeros
    rec0 = jnp.zeros((B, H4), f32)                # h0(-1) @ whh0 == 0

    # TODO(synk): nn.LSTM inter-layer dropout (p=0.1) is train-mode only; this
    # kernel implements deterministic eval-mode semantics.
    # Fully unrolled recurrence (T is small & static) for cross-step scheduling.
    for t in range(T):
        # layer 0 (serial chain: gate_update -> fused matmul -> next gate_update)
        g0 = xg0[t * B:(t + 1) * B, :] + rec0
        h0, c0 = gate_update(g0, c0)
        # layer-1 recurrent term only needs h1(t-1): off the critical path.
        m_bot = jnp.dot(h1, whh1_t, preferred_element_type=f32)          # (B, 4H)
        # fused push: lanes [0,4H) = recurrent part of g0(t+1),
        #             lanes [4H,8H) = wih1 part of g1(t).
        # (On v5e this 256-wide result is two pipelined 128-lane column passes.)
        m_top = jnp.dot(h0, w_top, preferred_element_type=f32)           # (B, 8H)
        rec0 = m_top[:, 0:H4]
        # layer 1
        g1 = m_top[:, H4:H8] + m_bot + b1b
        h1, c1 = gate_update(g1, c1)

    # --- MLP head (weights pre-padded to 128 lanes / 128 input rows; padded
    #     columns carry exact zeros so full-width matmuls are correct) ---
    z = jnp.maximum(jnp.dot(h1, head_ref[0:H, :], preferred_element_type=f32)
                    + act_proj, 0.0)
    z = jnp.maximum(jnp.dot(z, head_ref[r_w2:r_w3, :], preferred_element_type=f32)
                    + head_ref[r_b + 1:r_b + 2, :], 0.0)
    z = jnp.maximum(jnp.dot(z, head_ref[r_w3:r_w4, :], preferred_element_type=f32)
                    + head_ref[r_b + 2:r_b + 3, :], 0.0)
    z = jnp.maximum(jnp.dot(z, head_ref[r_w4:r_b, :], preferred_element_type=f32)
                    + head_ref[r_b + 3:r_b + 4, :], 0.0)
    o_ref[...] = z[:, 0:numactions]


def init_params(key, inputsize, hidden, numactions):
    """Deterministic synthetic parameters with the same shapes nn.LSTM/nn.Linear use."""
    def u(k, shape, scale):
        return jax.random.uniform(k, shape, jnp.float32, -scale, scale)

    ks = jax.random.split(key, 16)
    s_lstm = 1.0 / jnp.sqrt(hidden)
    return {
        # LSTM layer 0
        "wih0": u(ks[0], (4 * hidden, inputsize), s_lstm),
        "whh0": u(ks[1], (4 * hidden, hidden), s_lstm),
        "bih0": u(ks[2], (4 * hidden,), s_lstm),
        "bhh0": u(ks[3], (4 * hidden,), s_lstm),
        # LSTM layer 1
        "wih1": u(ks[4], (4 * hidden, hidden), s_lstm),
        "whh1": u(ks[5], (4 * hidden, hidden), s_lstm),
        "bih1": u(ks[6], (4 * hidden,), s_lstm),
        "bhh1": u(ks[7], (4 * hidden,), s_lstm),
        # MLP head
        "w1": u(ks[8], (64, hidden + 7), 1.0 / jnp.sqrt(hidden + 7)),
        "b1": u(ks[9], (64,), 1.0 / jnp.sqrt(hidden + 7)),
        "w2": u(ks[10], (32, 64), 1.0 / jnp.sqrt(64)),
        "b2": u(ks[11], (32,), 1.0 / jnp.sqrt(64)),
        "w3": u(ks[12], (8, 32), 1.0 / jnp.sqrt(32)),
        "b3": u(ks[13], (8,), 1.0 / jnp.sqrt(32)),
        "w4": u(ks[14], (numactions, 8), 1.0 / jnp.sqrt(8)),
        "b4": u(ks[15], (numactions,), 1.0 / jnp.sqrt(8)),
    }


def pack_params(params, *, inputsize, hidden, numactions):
    """One-time packing of all weights/biases into two VMEM slabs.

    The g-gate columns (cols 2H:3H of every 4H-wide gate block, PyTorch order
    i|f|g|o) are pre-scaled by 2 so the kernel evaluates tanh via 2*sigmoid-1.
    """
    H = hidden
    H4 = 4 * H

    def scale_g(w):
        return w.at[..., 2 * H:3 * H].multiply(2.0)

    wih0_t = scale_g(params["wih0"].T)                           # (I, 4H)
    whh0_t = scale_g(params["whh0"].T)                           # (H, 4H)
    wih1_t = scale_g(params["wih1"].T)                           # (H, 4H)
    whh1_t = scale_g(params["whh1"].T)                           # (H, 4H)
    b0 = scale_g(params["bih0"] + params["bhh0"])                # (4H,)
    b1 = scale_g(params["bih1"] + params["bhh1"])                # (4H,)

    lstm = jnp.zeros((2 * H + IPAD, 8 * H), jnp.float32)
    lstm = lstm.at[0:H, 0:H4].set(whh0_t)
    lstm = lstm.at[0:H, H4:2 * H4].set(wih1_t)
    lstm = lstm.at[H:2 * H, 0:H4].set(whh1_t)
    lstm = lstm.at[H:H + inputsize, H4:2 * H4].set(wih0_t)
    lstm = lstm.at[2 * H, 0:H4].set(b0)
    lstm = lstm.at[2 * H, H4:2 * H4].set(b1)

    r_w1a, r_w2, r_w3, r_w4, r_b, rows = _head_offsets(H)
    w1_t = params["w1"].T                                        # (H+7, 64)
    head = jnp.zeros((rows, 128), jnp.float32)
    head = head.at[0:H, 0:64].set(w1_t[0:H, :])                  # fc1 h-branch
    head = head.at[r_w1a:r_w1a + inputsize, 0:64].set(w1_t[H:H + inputsize, :])
    head = head.at[r_w2:r_w2 + 64, 0:32].set(params["w2"].T)
    head = head.at[r_w3:r_w3 + 32, 0:8].set(params["w3"].T)
    head = head.at[r_w4:r_w4 + 8, 0:numactions].set(params["w4"].T)
    head = head.at[r_b, 0:64].set(params["b1"])
    head = head.at[r_b + 1, 0:32].set(params["b2"])
    head = head.at[r_b + 2, 0:8].set(params["b3"])
    head = head.at[r_b + 3, 0:numactions].set(params["b4"])
    return {"lstm": lstm, "head": head}


@functools.partial(jax.jit, static_argnames=("hidden", "numactions"))
def critic_forward(packed, x, action, *, hidden, numactions):
    # TODO(synk): torch.linalg.matrix_rank(x) in the original forward is unused; omitted.
    x = jnp.asarray(x, jnp.float32)
    B, T, I = x.shape
    action = jnp.reshape(jnp.asarray(action, jnp.float32), (B, I))  # mirrors torch.reshape

    # Per-call layout plumbing only (weights were packed once in pack_params):
    # time-major flatten + pad the feature dim 7 -> 8 to match the padded slabs.
    x_tm = jnp.transpose(x, (1, 0, 2)).reshape(T * B, I)
    x_tm = jnp.pad(x_tm, ((0, 0), (0, IPAD - I)))
    act_p = jnp.pad(action, ((0, 0), (0, IPAD - I)))

    vmem = pl.BlockSpec(memory_space=pltpu.MemorySpace.VMEM)
    out = pl.pallas_call(
        functools.partial(critic_kernel, hidden=hidden, seq_len=T, batch=B,
                          numactions=numactions),
        out_shape=jax.ShapeDtypeStruct((B, numactions), jnp.float32),
        in_specs=[vmem, vmem, vmem, vmem],
        out_specs=vmem,
    )(x_tm, act_p, packed["lstm"], packed["head"])
    return out


def critic_reference(params, x, action, *, hidden):
    """Pure-JAX reference matching PyTorch LSTM/Linear semantics (eval-mode dropout)."""
    x = jnp.asarray(x, jnp.float32)
    B, T, I = x.shape
    action = jnp.reshape(jnp.asarray(action, jnp.float32), (B, I))

    def cell(x_t, h, c, wih, whh, bih, bhh):
        gates = x_t @ wih.T + bih + h @ whh.T + bhh
        i, f, g, o = jnp.split(gates, 4, axis=1)
        i, f, o = jax.nn.sigmoid(i), jax.nn.sigmoid(f), jax.nn.sigmoid(o)
        g = jnp.tanh(g)
        c = f * c + i * g
        h = o * jnp.tanh(c)
        return h, c

    h0 = c0 = h1 = c1 = jnp.zeros((B, hidden), jnp.float32)
    for t in range(T):
        h0, c0 = cell(x[:, t], h0, c0, params["wih0"], params["whh0"],
                      params["bih0"], params["bhh0"])
        h1, c1 = cell(h0, h1, c1, params["wih1"], params["whh1"],
                      params["bih1"], params["bhh1"])

    relu = lambda a: jnp.maximum(a, 0.0)
    z = jnp.concatenate([h1, action], axis=1)
    z = relu(z @ params["w1"].T + params["b1"])
    z = relu(z @ params["w2"].T + params["b2"])
    z = relu(z @ params["w3"].T + params["b3"])
    z = relu(z @ params["w4"].T + params["b4"])
    return z


if __name__ == "__main__":
    inputsize, hiddensize, numlayers, numactions = 7, 32, 2, 4
    B, T = 2, 8

    key = jax.random.PRNGKey(0)
    kp, kx, ka = jax.random.split(key, 3)
    params = init_params(kp, inputsize, hiddensize, numactions)
    packed = pack_params(params, inputsize=inputsize, hidden=hiddensize,
                         numactions=numactions)   # one-time weight packing

    x = jax.random.normal(kx, (B, T, inputsize), jnp.float32)
    action = jax.random.normal(ka, (B, inputsize), jnp.float32)

    out = critic_forward(packed, x, action, hidden=hiddensize, numactions=numactions)
    out = jax.block_until_ready(out)

    ref = critic_reference(params, x, action, hidden=hiddensize)
    assert out.shape == (B, numactions)
    # Tolerance slightly relaxed vs 1e-5: tanh is evaluated as 2*sigmoid(2x)-1
    # (pre-scaled g-gate columns), which drifts at the ~1e-7..1e-6 level.
    assert jnp.allclose(out, ref, atol=1e-4, rtol=1e-3), (out, ref)
    print("KERNEL_OK")
</pallas_src>

<mosaic_0001>
module attributes {stable_mosaic.version = 11 : i64} {
  func.func @critic_kernel(%arg0: memref<16x8xf32, #tpu.memory_space<vmem>>, %arg1: memref<2x8xf32, #tpu.memory_space<vmem>>, %arg2: memref<72x256xf32, #tpu.memory_space<vmem>>, %arg3: memref<432x128xf32, #tpu.memory_space<vmem>>, %arg4: memref<2x4xf32, #tpu.memory_space<vmem>>) attributes {dimension_semantics = [], scalar_prefetch = 0 : i64, scratch_operands = 0 : i64, tpu.core_type = #tpu.core_type<tc>} {
    %c0 = arith.constant 0 : index
    %c0_0 = arith.constant 0 : index
    %0 = vector.load %arg2[%c0, %c0_0] : memref<72x256xf32, #tpu.memory_space<vmem>>, vector<32x256xf32>
    %c32 = arith.constant 32 : index
    %c0_1 = arith.constant 0 : index
    %1 = vector.load %arg2[%c32, %c0_1] : memref<72x256xf32, #tpu.memory_space<vmem>>, vector<32x128xf32>
    %c32_2 = arith.constant 32 : index
    %c128 = arith.constant 128 : index
    %2 = vector.load %arg2[%c32_2, %c128] : memref<72x256xf32, #tpu.memory_space<vmem>>, vector<8x128xf32>
    %c64 = arith.constant 64 : index
    %c0_3 = arith.constant 0 : index
    %3 = vector.load %arg2[%c64, %c0_3] : memref<72x256xf32, #tpu.memory_space<vmem>>, vector<1x128xf32>
    %c64_4 = arith.constant 64 : index
    %c128_5 = arith.constant 128 : index
    %4 = vector.load %arg2[%c64_4, %c128_5] : memref<72x256xf32, #tpu.memory_space<vmem>>, vector<1x128xf32>
    %c0_6 = arith.constant 0 : index
    %c0_7 = arith.constant 0 : index
    %5 = vector.load %arg1[%c0_6, %c0_7] : memref<2x8xf32, #tpu.memory_space<vmem>>, vector<2x8xf32>
    %c32_8 = arith.constant 32 : index
    %c0_9 = arith.constant 0 : index
    %6 = vector.load %arg3[%c32_8, %c0_9] : memref<432x128xf32, #tpu.memory_space<vmem>>, vector<8x128xf32>
    %cst = arith.constant dense<0.000000e+00> : vector<2x128xf32>
    %7 = tpu.matmul %5, %6, %cst {dimension_numbers = #tpu.dot_dimension_numbers<[1], [0], [0], [1], [0, 0, 1, 1], [], []>} : vector<2x8xf32>, vector<8x128xf32>, vector<2x128xf32> -> vector<2x128xf32>
    %c424 = arith.constant 424 : index
    %c0_10 = arith.constant 0 : index
    %8 = vector.load %arg3[%c424, %c0_10] : memref<432x128xf32, #tpu.memory_space<vmem>>, vector<1x128xf32>
    %9 = vector.broadcast %8 : vector<1x128xf32> to vector<2x128xf32>
    %10 = arith.addf %7, %9 : vector<2x128xf32>
    %c0_11 = arith.constant 0 : index
    %c0_12 = arith.constant 0 : index
    %11 = vector.load %arg0[%c0_11, %c0_12] : memref<16x8xf32, #tpu.memory_space<vmem>>, vector<16x8xf32>
    %cst_13 = arith.constant dense<0.000000e+00> : vector<16x128xf32>
    %12 = tpu.matmul %11, %2, %cst_13 {dimension_numbers = #tpu.dot_dimension_numbers<[1], [0], [0], [1], [0, 0, 1, 1], [], []>} : vector<16x8xf32>, vector<8x128xf32>, vector<16x128xf32> -> vector<16x128xf32>
    %13 = vector.broadcast %3 : vector<1x128xf32> to vector<16x128xf32>
    %14 = arith.addf %12, %13 : vector<16x128xf32>
    %15 = vector.shape_cast %4 : vector<1x128xf32> to vector<1x128xf32>
    %16 = vector.broadcast %15 : vector<1x128xf32> to vector<2x128xf32>
    %cst_14 = arith.constant 0.000000e+00 : f32
    %17 = vector.broadcast %cst_14 : f32 to vector<2x32xf32>
    %cst_15 = arith.constant 0.000000e+00 : f32
    %18 = vector.broadcast %cst_15 : f32 to vector<2x128xf32>
    %19 = vector.extract_strided_slice %14 {offsets = [0, 0], sizes = [2, 128], strides = [1, 1]} : vector<16x128xf32> to vector<2x128xf32>
    %20 = arith.addf %19, %18 : vector<2x128xf32>
    %21 = arith.negf %20 : vector<2x128xf32>
    %22 = math.exp %21 : vector<2x128xf32>
    %cst_16 = arith.constant 1.000000e+00 : f32
    %23 = vector.broadcast %cst_16 : f32 to vector<2x128xf32>
    %24 = arith.addf %23, %22 : vector<2x128xf32>
    %25 = arith.divf %23, %24 : vector<2x128xf32>
    %26 = vector.extract_strided_slice %25 {offsets = [0, 0], sizes = [2, 32], strides = [1, 1]} : vector<2x128xf32> to vector<2x32xf32>
    %27 = vector.extract_strided_slice %25 {offsets = [0, 32], sizes = [2, 32], strides = [1, 1]} : vector<2x128xf32> to vector<2x32xf32>
    %28 = vector.extract_strided_slice %25 {offsets = [0, 64], sizes = [2, 32], strides = [1, 1]} : vector<2x128xf32> to vector<2x32xf32>
    %cst_17 = arith.constant 2.000000e+00 : f32
    %29 = vector.broadcast %cst_17 : f32 to vector<2x32xf32>
    %30 = arith.mulf %29, %28 : vector<2x32xf32>
    %cst_18 = arith.constant 1.000000e+00 : f32
    %31 = vector.broadcast %cst_18 : f32 to vector<2x32xf32>
    %32 = arith.subf %30, %31 : vector<2x32xf32>
    %33 = vector.extract_strided_slice %25 {offsets = [0, 96], sizes = [2, 32], strides = [1, 1]} : vector<2x128xf32> to vector<2x32xf32>
    %34 = arith.mulf %27, %17 : vector<2x32xf32>
    %35 = arith.mulf %26, %32 : vector<2x32xf32>
    %36 = arith.addf %34, %35 : vector<2x32xf32>
    %37 = math.tanh %36 : vector<2x32xf32>
    %38 = arith.mulf %33, %37 : vector<2x32xf32>
    %cst_19 = arith.constant dense<0.000000e+00> : vector<2x128xf32>
    %39 = tpu.matmul %17, %1, %cst_19 {dimension_numbers = #tpu.dot_dimension_numbers<[1], [0], [0], [1], [0, 0, 1, 1], [], []>} : vector<2x32xf32>, vector<32x128xf32>, vector<2x128xf32> -> vector<2x128xf32>
    %cst_20 = arith.constant dense<0.000000e+00> : vector<2x256xf32>
    %40 = tpu.matmul %38, %0, %cst_20 {dimension_numbers = #tpu.dot_dimension_numbers<[1], [0], [0], [1], [0, 0, 1, 1], [], []>} : vector<2x32xf32>, vector<32x256xf32>, vector<2x256xf32> -> vector<2x256xf32>
    %41 = vector.extract_strided_slice %40 {offsets = [0, 0], sizes = [2, 128], strides = [1, 1]} : vector<2x256xf32> to vector<2x128xf32>
    %42 = vector.extract_strided_slice %40 {offsets = [0, 128], sizes = [2, 128], strides = [1, 1]} : vector<2x256xf32> to vector<2x128xf32>
    %43 = arith.addf %42, %39 : vector<2x128xf32>
    %44 = arith.addf %43, %16 : vector<2x128xf32>
    %45 = arith.negf %44 : vector<2x128xf32>
    %46 = math.exp %45 : vector<2x128xf32>
    %cst_21 = arith.constant 1.000000e+00 : f32
    %47 = vector.broadcast %cst_21 : f32 to vector<2x128xf32>
    %48 = arith.addf %47, %46 : vector<2x128xf32>
    %49 = arith.divf %47, %48 : vector<2x128xf32>
    %50 = vector.extract_strided_slice %49 {offsets = [0, 0], sizes = [2, 32], strides = [1, 1]} : vector<2x128xf32> to vector<2x32xf32>
    %51 = vector.extract_strided_slice %49 {offsets = [0, 32], sizes = [2, 32], strides = [1, 1]} : vector<2x128xf32> to vector<2x32xf32>
    %52 = vector.extract_strided_slice %49 {offsets = [0, 64], sizes = [2, 32], strides = [1, 1]} : vector<2x128xf32> to vector<2x32xf32>
    %cst_22 = arith.constant 2.000000e+00 : f32
    %53 = vector.broadcast %cst_22 : f32 to vector<2x32xf32>
    %54 = arith.mulf %53, %52 : vector<2x32xf32>
    %cst_23 = arith.constant 1.000000e+00 : f32
    %55 = vector.broadcast %cst_23 : f32 to vector<2x32xf32>
    %56 = arith.subf %54, %55 : vector<2x32xf32>
    %57 = vector.extract_strided_slice %49 {offsets = [0, 96], sizes = [2, 32], strides = [1, 1]} : vector<2x128xf32> to vector<2x32xf32>
    %58 = arith.mulf %51, %17 : vector<2x32xf32>
    %59 = arith.mulf %50, %56 : vector<2x32xf32>
    %60 = arith.addf %58, %59 : vector<2x32xf32>
    %61 = math.tanh %60 : vector<2x32xf32>
    %62 = arith.mulf %57, %61 : vector<2x32xf32>
    %63 = vector.extract_strided_slice %14 {offsets = [2, 0], sizes = [2, 128], strides = [1, 1]} : vector<16x128xf32> to vector<2x128xf32>
    %64 = arith.addf %63, %41 : vector<2x128xf32>
    %65 = arith.negf %64 : vector<2x128xf32>
    %66 = math.exp %65 : vector<2x128xf32>
    %cst_24 = arith.constant 1.000000e+00 : f32
    %67 = vector.broadcast %cst_24 : f32 to vector<2x128xf32>
    %68 = arith.addf %67, %66 : vector<2x128xf32>
    %69 = arith.divf %67, %68 : vector<2x128xf32>
    %70 = vector.extract_strided_slice %69 {offsets = [0, 0], sizes = [2, 32], strides = [1, 1]} : vector<2x128xf32> to vector<2x32xf32>
    %71 = vector.extract_strided_slice %69 {offsets = [0, 32], sizes = [2, 32], strides = [1, 1]} : vector<2x128xf32> to vector<2x32xf32>
    %72 = vector.extract_strided_slice %69 {offsets = [0, 64], sizes = [2, 32], strides = [1, 1]} : vector<2x128xf32> to vector<2x32xf32>
    %cst_25 = arith.constant 2.000000e+00 : f32
    %73 = vector.broadcast %cst_25 : f32 to vector<2x32xf32>
    %74 = arith.mulf %73, %72 : vector<2x32xf32>
    %cst_26 = arith.constant 1.000000e+00 : f32
    %75 = vector.broadcast %cst_26 : f32 to vector<2x32xf32>
    %76 = arith.subf %74, %75 : vector<2x32xf32>
    %77 = vector.extract_strided_slice %69 {offsets = [0, 96], sizes = [2, 32], strides = [1, 1]} : vector<2x128xf32> to vector<2x32xf32>
    %78 = arith.mulf %71, %36 : vector<2x32xf32>
    %79 = arith.mulf %70, %76 : vector<2x32xf32>
    %80 = arith.addf %78, %79 : vector<2x32xf32>
    %81 = math.tanh %80 : vector<2x32xf32>
    %82 = arith.mulf %77, %81 : vector<2x32xf32>
    %cst_27 = arith.constant dense<0.000000e+00> : vector<2x128xf32>
    %83 = tpu.matmul %62, %1, %cst_27 {dimension_numbers = #tpu.dot_dimension_numbers<[1], [0], [0], [1], [0, 0, 1, 1], [], []>} : vector<2x32xf32>, vector<32x128xf32>, vector<2x128xf32> -> vector<2x128xf32>
    %cst_28 = arith.constant dense<0.000000e+00> : vector<2x256xf32>
    %84 = tpu.matmul %82, %0, %cst_28 {dimension_numbers = #tpu.dot_dimension_numbers<[1], [0], [0], [1], [0, 0, 1, 1], [], []>} : vector<2x32xf32>, vector<32x256xf32>, vector<2x256xf32> -> vector<2x256xf32>
    %85 = vector.extract_strided_slice %84 {offsets = [0, 0], sizes = [2, 128], strides = [1, 1]} : vector<2x256xf32> to vector<2x128xf32>
    %86 = vector.extract_strided_slice %84 {offsets = [0, 128], sizes = [2, 128], strides = [1, 1]} : vector<2x256xf32> to vector<2x128xf32>
    %87 = arith.addf %86, %83 : vector<2x128xf32>
    %88 = arith.addf %87, %16 : vector<2x128xf32>
    %89 = arith.negf %88 : vector<2x128xf32>
    %90 = math.exp %89 : vector<2x128xf32>
    %cst_29 = arith.constant 1.000000e+00 : f32
    %91 = vector.broadcast %cst_29 : f32 to vector<2x128xf32>
    %92 = arith.addf %91, %90 : vector<2x128xf32>
    %93 = arith.divf %91, %92 : vector<2x128xf32>
    %94 = vector.extract_strided_slice %93 {offsets = [0, 0], sizes = [2, 32], strides = [1, 1]} : vector<2x128xf32> to vector<2x32xf32>
    %95 = vector.extract_strided_slice %93 {offsets = [0, 32], sizes = [2, 32], strides = [1, 1]} : vector<2x128xf32> to vector<2x32xf32>
    %96 = vector.extract_strided_slice %93 {offsets = [0, 64], sizes = [2, 32], strides = [1, 1]} : vector<2x128xf32> to vector<2x32xf32>
    %cst_30 = arith.constant 2.000000e+00 : f32
    %97 = vector.broadcast %cst_30 : f32 to vector<2x32xf32>
    %98 = arith.mulf %97, %96 : vector<2x32xf32>
    %cst_31 = arith.constant 1.000000e+00 : f32
    %99 = vector.broadcast %cst_31 : f32 to vector<2x32xf32>
    %100 = arith.subf %98, %99 : vector<2x32xf32>
    %101 = vector.extract_strided_slice %93 {offsets = [0, 96], sizes = [2, 32], strides = [1, 1]} : vector<2x128xf32> to vector<2x32xf32>
    %102 = arith.mulf %95, %60 : vector<2x32xf32>
    %103 = arith.mulf %94, %100 : vector<2x32xf32>
    %104 = arith.addf %102, %103 : vector<2x32xf32>
    %105 = math.tanh %104 : vector<2x32xf32>
    %106 = arith.mulf %101, %105 : vector<2x32xf32>
    %107 = vector.extract_strided_slice %14 {offsets = [4, 0], sizes = [2, 128], strides = [1, 1]} : vector<16x128xf32> to vector<2x128xf32>
    %108 = arith.addf %107, %85 : vector<2x128xf32>
    %109 = arith.negf %108 : vector<2x128xf32>
    %110 = math.exp %109 : vector<2x128xf32>
    %cst_32 = arith.constant 1.000000e+00 : f32
    %111 = vector.broadcast %cst_32 : f32 to vector<2x128xf32>
    %112 = arith.addf %111, %110 : vector<2x128xf32>
    %113 = arith.divf %111, %112 : vector<2x128xf32>
    %114 = vector.extract_strided_slice %113 {offsets = [0, 0], sizes = [2, 32], strides = [1, 1]} : vector<2x128xf32> to vector<2x32xf32>
    %115 = vector.extract_strided_slice %113 {offsets = [0, 32], sizes = [2, 32], strides = [1, 1]} : vector<2x128xf32> to vector<2x32xf32>
    %116 = vector.extract_strided_slice %113 {offsets = [0, 64], sizes = [2, 32], strides = [1, 1]} : vector<2x128xf32> to vector<2x32xf32>
    %cst_33 = arith.constant 2.000000e+00 : f32
    %117 = vector.broadcast %cst_33 : f32 to vector<2x32xf32>
    %118 = arith.mulf %117, %116 : vector<2x32xf32>
    %cst_34 = arith.constant 1.000000e+00 : f32
    %119 = vector.broadcast %cst_34 : f32 to vector<2x32xf32>
    %120 = arith.subf %118, %119 : vector<2x32xf32>
    %121 = vector.extract_strided_slice %113 {offsets = [0, 96], sizes = [2, 32], strides = [1, 1]} : vector<2x128xf32> to vector<2x32xf32>
    %122 = arith.mulf %115, %80 : vector<2x32xf32>
    %123 = arith.mulf %114, %120 : vector<2x32xf32>
    %124 = arith.addf %122, %123 : vector<2x32xf32>
    %125 = math.tanh %124 : vector<2x32xf32>
    %126 = arith.mulf %121, %125 : vector<2x32xf32>
    %cst_35 = arith.constant dense<0.000000e+00> : vector<2x128xf32>
    %127 = tpu.matmul %106, %1, %cst_35 {dimension_numbers = #tpu.dot_dimension_numbers<[1], [0], [0], [1], [0, 0, 1, 1], [], []>} : vector<2x32xf32>, vector<32x128xf32>, vector<2x128xf32> -> vector<2x128xf32>
    %cst_36 = arith.constant dense<0.000000e+00> : vector<2x256xf32>
    %128 = tpu.matmul %126, %0, %cst_36 {dimension_numbers = #tpu.dot_dimension_numbers<[1], [0], [0], [1], [0, 0, 1, 1], [], []>} : vector<2x32xf32>, vector<32x256xf32>, vector<2x256xf32> -> vector<2x256xf32>
    %129 = vector.extract_strided_slice %128 {offsets = [0, 0], sizes = [2, 128], strides = [1, 1]} : vector<2x256xf32> to vector<2x128xf32>
    %130 = vector.extract_strided_slice %128 {offsets = [0, 128], sizes = [2, 128], strides = [1, 1]} : vector<2x256xf32> to vector<2x128xf32>
    %131 = arith.addf %130, %127 : vector<2x128xf32>
    %132 = arith.addf %131, %16 : vector<2x128xf32>
    %133 = arith.negf %132 : vector<2x128xf32>
    %134 = math.exp %133 : vector<2x128xf32>
    %cst_37 = arith.constant 1.000000e+00 : f32
    %135 = vector.broadcast %cst_37 : f32 to vector<2x128xf32>
    %136 = arith.addf %135, %134 : vector<2x128xf32>
    %137 = arith.divf %135, %136 : vector<2x128xf32>
    %138 = vector.extract_strided_slice %137 {offsets = [0, 0], sizes = [2, 32], strides = [1, 1]} : vector<2x128xf32> to vector<2x32xf32>
    %139 = vector.extract_strided_slice %137 {offsets = [0, 32], sizes = [2, 32], strides = [1, 1]} : vector<2x128xf32> to vector<2x32xf32>
    %140 = vector.extract_strided_slice %137 {offsets = [0, 64], sizes = [2, 32], strides = [1, 1]} : vector<2x128xf32> to vector<2x32xf32>
    %cst_38 = arith.constant 2.000000e+00 : f32
    %141 = vector.broadcast %cst_38 : f32 to vector<2x32xf32>
    %142 = arith.mulf %141, %140 : vector<2x32xf32>
    %cst_39 = arith.constant 1.000000e+00 : f32
    %143 = vector.broadcast %cst_39 : f32 to vector<2x32xf32>
    %144 = arith.subf %142, %143 : vector<2x32xf32>
    %145 = vector.extract_strided_slice %137 {offsets = [0, 96], sizes = [2, 32], strides = [1, 1]} : vector<2x128xf32> to vector<2x32xf32>
    %146 = arith.mulf %139, %104 : vector<2x32xf32>
    %147 = arith.mulf %138, %144 : vector<2x32xf32>
    %148 = arith.addf %146, %147 : vector<2x32xf32>
    %149 = math.tanh %148 : vector<2x32xf32>
    %150 = arith.mulf %145, %149 : vector<2x32xf32>
    %151 = vector.extract_strided_slice %14 {offsets = [6, 0], sizes = [2, 128], strides = [1, 1]} : vector<16x128xf32> to vector<2x128xf32>
    %152 = arith.addf %151, %129 : vector<2x128xf32>
    %153 = arith.negf %152 : vector<2x128xf32>
    %154 = math.exp %153 : vector<2x128xf32>
    %cst_40 = arith.constant 1.000000e+00 : f32
    %155 = vector.broadcast %cst_40 : f32 to vector<2x128xf32>
    %156 = arith.addf %155, %154 : vector<2x128xf32>
    %157 = arith.divf %155, %156 : vector<2x128xf32>
    %158 = vector.extract_strided_slice %157 {offsets = [0, 0], sizes = [2, 32], strides = [1, 1]} : vector<2x128xf32> to vector<2x32xf32>
    %159 = vector.extract_strided_slice %157 {offsets = [0, 32], sizes = [2, 32], strides = [1, 1]} : vector<2x128xf32> to vector<2x32xf32>
    %160 = vector.extract_strided_slice %157 {offsets = [0, 64], sizes = [2, 32], strides = [1, 1]} : vector<2x128xf32> to vector<2x32xf32>
    %cst_41 = arith.constant 2.000000e+00 : f32
    %161 = vector.broadcast %cst_41 : f32 to vector<2x32xf32>
    %162 = arith.mulf %161, %160 : vector<2x32xf32>
    %cst_42 = arith.constant 1.000000e+00 : f32
    %163 = vector.broadcast %cst_42 : f32 to vector<2x32xf32>
    %164 = arith.subf %162, %163 : vector<2x32xf32>
    %165 = vector.extract_strided_slice %157 {offsets = [0, 96], sizes = [2, 32], strides = [1, 1]} : vector<2x128xf32> to vector<2x32xf32>
    %166 = arith.mulf %159, %124 : vector<2x32xf32>
    %167 = arith.mulf %158, %164 : vector<2x32xf32>
    %168 = arith.addf %166, %167 : vector<2x32xf32>
    %169 = math.tanh %168 : vector<2x32xf32>
    %170 = arith.mulf %165, %169 : vector<2x32xf32>
    %cst_43 = arith.constant dense<0.000000e+00> : vector<2x128xf32>
    %171 = tpu.matmul %150, %1, %cst_43 {dimension_numbers = #tpu.dot_dimension_numbers<[1], [0], [0], [1], [0, 0, 1, 1], [], []>} : vector<2x32xf32>, vector<32x128xf32>, vector<2x128xf32> -> vector<2x128xf32>
    %cst_44 = arith.constant dense<0.000000e+00> : vector<2x256xf32>
    %172 = tpu.matmul %170, %0, %cst_44 {dimension_numbers = #tpu.dot_dimension_numbers<[1], [0], [0], [1], [0, 0, 1, 1], [], []>} : vector<2x32xf32>, vector<32x256xf32>, vector<2x256xf32> -> vector<2x256xf32>
    %173 = vector.extract_strided_slice %172 {offsets = [0, 0], sizes = [2, 128], strides = [1, 1]} : vector<2x256xf32> to vector<2x128xf32>
    %174 = vector.extract_strided_slice %172 {offsets = [0, 128], sizes = [2, 128], strides = [1, 1]} : vector<2x256xf32> to vector<2x128xf32>
    %175 = arith.addf %174, %171 : vector<2x128xf32>
    %176 = arith.addf %175, %16 : vector<2x128xf32>
    %177 = arith.negf %176 : vector<2x128xf32>
    %178 = math.exp %177 : vector<2x128xf32>
    %cst_45 = arith.constant 1.000000e+00 : f32
    %179 = vector.broadcast %cst_45 : f32 to vector<2x128xf32>
    %180 = arith.addf %179, %178 : vector<2x128xf32>
    %181 = arith.divf %179, %180 : vector<2x128xf32>
    %182 = vector.extract_strided_slice %181 {offsets = [0, 0], sizes = [2, 32], strides = [1, 1]} : vector<2x128xf32> to vector<2x32xf32>
    %183 = vector.extract_strided_slice %181 {offsets = [0, 32], sizes = [2, 32], strides = [1, 1]} : vector<2x128xf32> to vector<2x32xf32>
    %184 = vector.extract_strided_slice %181 {offsets = [0, 64], sizes = [2, 32], strides = [1, 1]} : vector<2x128xf32> to vector<2x32xf32>
    %cst_46 = arith.constant 2.000000e+00 : f32
    %185 = vector.broadcast %cst_46 : f32 to vector<2x32xf32>
    %186 = arith.mulf %185, %184 : vector<2x32xf32>
    %cst_47 = arith.constant 1.000000e+00 : f32
    %187 = vector.broadcast %cst_47 : f32 to vector<2x32xf32>
    %188 = arith.subf %186, %187 : vector<2x32xf32>
    %189 = vector.extract_strided_slice %181 {offsets = [0, 96], sizes = [2, 32], strides = [1, 1]} : vector<2x128xf32> to vector<2x32xf32>
    %190 = arith.mulf %183, %148 : vector<2x32xf32>
    %191 = arith.mulf %182, %188 : vector<2x32xf32>
    %192 = arith.addf %190, %191 : vector<2x32xf32>
    %193 = math.tanh %192 : vector<2x32xf32>
    %194 = arith.mulf %189, %193 : vector<2x32xf32>
    %195 = vector.extract_strided_slice %14 {offsets = [8, 0], sizes = [2, 128], strides = [1, 1]} : vector<16x128xf32> to vector<2x128xf32>
    %196 = arith.addf %195, %173 : vector<2x128xf32>
    %197 = arith.negf %196 : vector<2x128xf32>
    %198 = math.exp %197 : vector<2x128xf32>
    %cst_48 = arith.constant 1.000000e+00 : f32
    %199 = vector.broadcast %cst_48 : f32 to vector<2x128xf32>
    %200 = arith.addf %199, %198 : vector<2x128xf32>
    %201 = arith.divf %199, %200 : vector<2x128xf32>
    %202 = vector.extract_strided_slice %201 {offsets = [0, 0], sizes = [2, 32], strides = [1, 1]} : vector<2x128xf32> to vector<2x32xf32>
    %203 = vector.extract_strided_slice %201 {offsets = [0, 32], sizes = [2, 32], strides = [1, 1]} : vector<2x128xf32> to vector<2x32xf32>
    %204 = vector.extract_strided_slice %201 {offsets = [0, 64], sizes = [2, 32], strides = [1, 1]} : vector<2x128xf32> to vector<2x32xf32>
    %cst_49 = arith.constant 2.000000e+00 : f32
    %205 = vector.broadcast %cst_49 : f32 to vector<2x32xf32>
    %206 = arith.mulf %205, %204 : vector<2x32xf32>
    %cst_50 = arith.constant 1.000000e+00 : f32
    %207 = vector.broadcast %cst_50 : f32 to vector<2x32xf32>
    %208 = arith.subf %206, %207 : vector<2x32xf32>
    %209 = vector.extract_strided_slice %201 {offsets = [0, 96], sizes = [2, 32], strides = [1, 1]} : vector<2x128xf32> to vector<2x32xf32>
    %210 = arith.mulf %203, %168 : vector<2x32xf32>
    %211 = arith.mulf %202, %208 : vector<2x32xf32>
    %212 = arith.addf %210, %211 : vector<2x32xf32>
    %213 = math.tanh %212 : vector<2x32xf32>
    %214 = arith.mulf %209, %213 : vector<2x32xf32>
    %cst_51 = arith.constant dense<0.000000e+00> : vector<2x128xf32>
    %215 = tpu.matmul %194, %1, %cst_51 {dimension_numbers = #tpu.dot_dimension_numbers<[1], [0], [0], [1], [0, 0, 1, 1], [], []>} : vector<2x32xf32>, vector<32x128xf32>, vector<2x128xf32> -> vector<2x128xf32>
    %cst_52 = arith.constant dense<0.000000e+00> : vector<2x256xf32>
    %216 = tpu.matmul %214, %0, %cst_52 {dimension_numbers = #tpu.dot_dimension_numbers<[1], [0], [0], [1], [0, 0, 1, 1], [], []>} : vector<2x32xf32>, vector<32x256xf32>, vector<2x256xf32> -> vector<2x256xf32>
    %217 = vector.extract_strided_slice %216 {offsets = [0, 0], sizes = [2, 128], strides = [1, 1]} : vector<2x256xf32> to vector<2x128xf32>
    %218 = vector.extract_strided_slice %216 {offsets = [0, 128], sizes = [2, 128], strides = [1, 1]} : vector<2x256xf32> to vector<2x128xf32>
    %219 = arith.addf %218, %215 : vector<2x128xf32>
    %220 = arith.addf %219, %16 : vector<2x128xf32>
    %221 = arith.negf %220 : vector<2x128xf32>
    %222 = math.exp %221 : vector<2x128xf32>
    %cst_53 = arith.constant 1.000000e+00 : f32
    %223 = vector.broadcast %cst_53 : f32 to vector<2x128xf32>
    %224 = arith.addf %223, %222 : vector<2x128xf32>
    %225 = arith.divf %223, %224 : vector<2x128xf32>
    %226 = vector.extract_strided_slice %225 {offsets = [0, 0], sizes = [2, 32], strides = [1, 1]} : vector<2x128xf32> to vector<2x32xf32>
    %227 = vector.extract_strided_slice %225 {offsets = [0, 32], sizes = [2, 32], strides = [1, 1]} : vector<2x128xf32> to vector<2x32xf32>
    %228 = vector.extract_strided_slice %225 {offsets = [0, 64], sizes = [2, 32], strides = [1, 1]} : vector<2x128xf32> to vector<2x32xf32>
    %cst_54 = arith.constant 2.000000e+00 : f32
    %229 = vector.broadcast %cst_54 : f32 to vector<2x32xf32>
    %230 = arith.mulf %229, %228 : vector<2x32xf32>
    %cst_55 = arith.constant 1.000000e+00 : f32
    %231 = vector.broadcast %cst_55 : f32 to vector<2x32xf32>
    %232 = arith.subf %230, %231 : vector<2x32xf32>
    %233 = vector.extract_strided_slice %225 {offsets = [0, 96], sizes = [2, 32], strides = [1, 1]} : vector<2x128xf32> to vector<2x32xf32>
    %234 = arith.mulf %227, %192 : vector<2x32xf32>
    %235 = arith.mulf %226, %232 : vector<2x32xf32>
    %236 = arith.addf %234, %235 : vector<2x32xf32>
    %237 = math.tanh %236 : vector<2x32xf32>
    %238 = arith.mulf %233, %237 : vector<2x32xf32>
    %239 = vector.extract_strided_slice %14 {offsets = [10, 0], sizes = [2, 128], strides = [1, 1]} : vector<16x128xf32> to vector<2x128xf32>
    %240 = arith.addf %239, %217 : vector<2x128xf32>
    %241 = arith.negf %240 : vector<2x128xf32>
    %242 = math.exp %241 : vector<2x128xf32>
    %cst_56 = arith.constant 1.000000e+00 : f32
    %243 = vector.broadcast %cst_56 : f32 to vector<2x128xf32>
    %244 = arith.addf %243, %242 : vector<2x128xf32>
    %245 = arith.divf %243, %244 : vector<2x128xf32>
    %246 = vector.extract_strided_slice %245 {offsets = [0, 0], sizes = [2, 32], strides = [1, 1]} : vector<2x128xf32> to vector<2x32xf32>
    %247 = vector.extract_strided_slice %245 {offsets = [0, 32], sizes = [2, 32], strides = [1, 1]} : vector<2x128xf32> to vector<2x32xf32>
    %248 = vector.extract_strided_slice %245 {offsets = [0, 64], sizes = [2, 32], strides = [1, 1]} : vector<2x128xf32> to vector<2x32xf32>
    %cst_57 = arith.constant 2.000000e+00 : f32
    %249 = vector.broadcast %cst_57 : f32 to vector<2x32xf32>
    %250 = arith.mulf %249, %248 : vector<2x32xf32>
    %cst_58 = arith.constant 1.000000e+00 : f32
    %251 = vector.broadcast %cst_58 : f32 to vector<2x32xf32>
    %252 = arith.subf %250, %251 : vector<2x32xf32>
    %253 = vector.extract_strided_slice %245 {offsets = [0, 96], sizes = [2, 32], strides = [1, 1]} : vector<2x128xf32> to vector<2x32xf32>
    %254 = arith.mulf %247, %212 : vector<2x32xf32>
    %255 = arith.mulf %246, %252 : vector<2x32xf32>
    %256 = arith.addf %254, %255 : vector<2x32xf32>
    %257 = math.tanh %256 : vector<2x32xf32>
    %258 = arith.mulf %253, %257 : vector<2x32xf32>
    %cst_59 = arith.constant dense<0.000000e+00> : vector<2x128xf32>
    %259 = tpu.matmul %238, %1, %cst_59 {dimension_numbers = #tpu.dot_dimension_numbers<[1], [0], [0], [1], [0, 0, 1, 1], [], []>} : vector<2x32xf32>, vector<32x128xf32>, vector<2x128xf32> -> vector<2x128xf32>
    %cst_60 = arith.constant dense<0.000000e+00> : vector<2x256xf32>
    %260 = tpu.matmul %258, %0, %cst_60 {dimension_numbers = #tpu.dot_dimension_numbers<[1], [0], [0], [1], [0, 0, 1, 1], [], []>} : vector<2x32xf32>, vector<32x256xf32>, vector<2x256xf32> -> vector<2x256xf32>
    %261 = vector.extract_strided_slice %260 {offsets = [0, 0], sizes = [2, 128], strides = [1, 1]} : vector<2x256xf32> to vector<2x128xf32>
    %262 = vector.extract_strided_slice %260 {offsets = [0, 128], sizes = [2, 128], strides = [1, 1]} : vector<2x256xf32> to vector<2x128xf32>
    %263 = arith.addf %262, %259 : vector<2x128xf32>
    %264 = arith.addf %263, %16 : vector<2x128xf32>
    %265 = arith.negf %264 : vector<2x128xf32>
    %266 = math.exp %265 : vector<2x128xf32>
    %cst_61 = arith.constant 1.000000e+00 : f32
    %267 = vector.broadcast %cst_61 : f32 to vector<2x128xf32>
    %268 = arith.addf %267, %266 : vector<2x128xf32>
    %269 = arith.divf %267, %268 : vector<2x128xf32>
    %270 = vector.extract_strided_slice %269 {offsets = [0, 0], sizes = [2, 32], strides = [1, 1]} : vector<2x128xf32> to vector<2x32xf32>
    %271 = vector.extract_strided_slice %269 {offsets = [0, 32], sizes = [2, 32], strides = [1, 1]} : vector<2x128xf32> to vector<2x32xf32>
    %272 = vector.extract_strided_slice %269 {offsets = [0, 64], sizes = [2, 32], strides = [1, 1]} : vector<2x128xf32> to vector<2x32xf32>
    %cst_62 = arith.constant 2.000000e+00 : f32
    %273 = vector.broadcast %cst_62 : f32 to vector<2x32xf32>
    %274 = arith.mulf %273, %272 : vector<2x32xf32>
    %cst_63 = arith.constant 1.000000e+00 : f32
    %275 = vector.broadcast %cst_63 : f32 to vector<2x32xf32>
    %276 = arith.subf %274, %275 : vector<2x32xf32>
    %277 = vector.extract_strided_slice %269 {offsets = [0, 96], sizes = [2, 32], strides = [1, 1]} : vector<2x128xf32> to vector<2x32xf32>
    %278 = arith.mulf %271, %236 : vector<2x32xf32>
    %279 = arith.mulf %270, %276 : vector<2x32xf32>
    %280 = arith.addf %278, %279 : vector<2x32xf32>
    %281 = math.tanh %280 : vector<2x32xf32>
    %282 = arith.mulf %277, %281 : vector<2x32xf32>
    %283 = vector.extract_strided_slice %14 {offsets = [12, 0], sizes = [2, 128], strides = [1, 1]} : vector<16x128xf32> to vector<2x128xf32>
    %284 = arith.addf %283, %261 : vector<2x128xf32>
    %285 = arith.negf %284 : vector<2x128xf32>
    %286 = math.exp %285 : vector<2x128xf32>
    %cst_64 = arith.constant 1.000000e+00 : f32
    %287 = vector.broadcast %cst_64 : f32 to vector<2x128xf32>
    %288 = arith.addf %287, %286 : vector<2x128xf32>
    %289 = arith.divf %287, %288 : vector<2x128xf32>
    %290 = vector.extract_strided_slice %289 {offsets = [0, 0], sizes = [2, 32], strides = [1, 1]} : vector<2x128xf32> to vector<2x32xf32>
    %291 = vector.extract_strided_slice %289 {offsets = [0, 32], sizes = [2, 32], strides = [1, 1]} : vector<2x128xf32> to vector<2x32xf32>
    %292 = vector.extract_strided_slice %289 {offsets = [0, 64], sizes = [2, 32], strides = [1, 1]} : vector<2x128xf32> to vector<2x32xf32>
    %cst_65 = arith.constant 2.000000e+00 : f32
    %293 = vector.broadcast %cst_65 : f32 to vector<2x32xf32>
    %294 = arith.mulf %293, %292 : vector<2x32xf32>
    %cst_66 = arith.constant 1.000000e+00 : f32
    %295 = vector.broadcast %cst_66 : f32 to vector<2x32xf32>
    %296 = arith.subf %294, %295 : vector<2x32xf32>
    %297 = vector.extract_strided_slice %289 {offsets = [0, 96], sizes = [2, 32], strides = [1, 1]} : vector<2x128xf32> to vector<2x32xf32>
    %298 = arith.mulf %291, %256 : vector<2x32xf32>
    %299 = arith.mulf %290, %296 : vector<2x32xf32>
    %300 = arith.addf %298, %299 : vector<2x32xf32>
    %301 = math.tanh %300 : vector<2x32xf32>
    %302 = arith.mulf %297, %301 : vector<2x32xf32>
    %cst_67 = arith.constant dense<0.000000e+00> : vector<2x128xf32>
    %303 = tpu.matmul %282, %1, %cst_67 {dimension_numbers = #tpu.dot_dimension_numbers<[1], [0], [0], [1], [0, 0, 1, 1], [], []>} : vector<2x32xf32>, vector<32x128xf32>, vector<2x128xf32> -> vector<2x128xf32>
    %cst_68 = arith.constant dense<0.000000e+00> : vector<2x256xf32>
    %304 = tpu.matmul %302, %0, %cst_68 {dimension_numbers = #tpu.dot_dimension_numbers<[1], [0], [0], [1], [0, 0, 1, 1], [], []>} : vector<2x32xf32>, vector<32x256xf32>, vector<2x256xf32> -> vector<2x256xf32>
    %305 = vector.extract_strided_slice %304 {offsets = [0, 0], sizes = [2, 128], strides = [1, 1]} : vector<2x256xf32> to vector<2x128xf32>
    %306 = vector.extract_strided_slice %304 {offsets = [0, 128], sizes = [2, 128], strides = [1, 1]} : vector<2x256xf32> to vector<2x128xf32>
    %307 = arith.addf %306, %303 : vector<2x128xf32>
    %308 = arith.addf %307, %16 : vector<2x128xf32>
    %309 = arith.negf %308 : vector<2x128xf32>
    %310 = math.exp %309 : vector<2x128xf32>
    %cst_69 = arith.constant 1.000000e+00 : f32
    %311 = vector.broadcast %cst_69 : f32 to vector<2x128xf32>
    %312 = arith.addf %311, %310 : vector<2x128xf32>
    %313 = arith.divf %311, %312 : vector<2x128xf32>
    %314 = vector.extract_strided_slice %313 {offsets = [0, 0], sizes = [2, 32], strides = [1, 1]} : vector<2x128xf32> to vector<2x32xf32>
    %315 = vector.extract_strided_slice %313 {offsets = [0, 32], sizes = [2, 32], strides = [1, 1]} : vector<2x128xf32> to vector<2x32xf32>
    %316 = vector.extract_strided_slice %313 {offsets = [0, 64], sizes = [2, 32], strides = [1, 1]} : vector<2x128xf32> to vector<2x32xf32>
    %cst_70 = arith.constant 2.000000e+00 : f32
    %317 = vector.broadcast %cst_70 : f32 to vector<2x32xf32>
    %318 = arith.mulf %317, %316 : vector<2x32xf32>
    %cst_71 = arith.constant 1.000000e+00 : f32
    %319 = vector.broadcast %cst_71 : f32 to vector<2x32xf32>
    %320 = arith.subf %318, %319 : vector<2x32xf32>
    %321 = vector.extract_strided_slice %313 {offsets = [0, 96], sizes = [2, 32], strides = [1, 1]} : vector<2x128xf32> to vector<2x32xf32>
    %322 = arith.mulf %315, %280 : vector<2x32xf32>
    %323 = arith.mulf %314, %320 : vector<2x32xf32>
    %324 = arith.addf %322, %323 : vector<2x32xf32>
    %325 = math.tanh %324 : vector<2x32xf32>
    %326 = arith.mulf %321, %325 : vector<2x32xf32>
    %327 = vector.extract_strided_slice %14 {offsets = [14, 0], sizes = [2, 128], strides = [1, 1]} : vector<16x128xf32> to vector<2x128xf32>
    %328 = arith.addf %327, %305 : vector<2x128xf32>
    %329 = arith.negf %328 : vector<2x128xf32>
    %330 = math.exp %329 : vector<2x128xf32>
    %cst_72 = arith.constant 1.000000e+00 : f32
    %331 = vector.broadcast %cst_72 : f32 to vector<2x128xf32>
    %332 = arith.addf %331, %330 : vector<2x128xf32>
    %333 = arith.divf %331, %332 : vector<2x128xf32>
    %334 = vector.extract_strided_slice %333 {offsets = [0, 0], sizes = [2, 32], strides = [1, 1]} : vector<2x128xf32> to vector<2x32xf32>
    %335 = vector.extract_strided_slice %333 {offsets = [0, 32], sizes = [2, 32], strides = [1, 1]} : vector<2x128xf32> to vector<2x32xf32>
    %336 = vector.extract_strided_slice %333 {offsets = [0, 64], sizes = [2, 32], strides = [1, 1]} : vector<2x128xf32> to vector<2x32xf32>
    %cst_73 = arith.constant 2.000000e+00 : f32
    %337 = vector.broadcast %cst_73 : f32 to vector<2x32xf32>
    %338 = arith.mulf %337, %336 : vector<2x32xf32>
    %cst_74 = arith.constant 1.000000e+00 : f32
    %339 = vector.broadcast %cst_74 : f32 to vector<2x32xf32>
    %340 = arith.subf %338, %339 : vector<2x32xf32>
    %341 = vector.extract_strided_slice %333 {offsets = [0, 96], sizes = [2, 32], strides = [1, 1]} : vector<2x128xf32> to vector<2x32xf32>
    %342 = arith.mulf %335, %300 : vector<2x32xf32>
    %343 = arith.mulf %334, %340 : vector<2x32xf32>
    %344 = arith.addf %342, %343 : vector<2x32xf32>
    %345 = math.tanh %344 : vector<2x32xf32>
    %346 = arith.mulf %341, %345 : vector<2x32xf32>
    %cst_75 = arith.constant dense<0.000000e+00> : vector<2x128xf32>
    %347 = tpu.matmul %326, %1, %cst_75 {dimension_numbers = #tpu.dot_dimension_numbers<[1], [0], [0], [1], [0, 0, 1, 1], [], []>} : vector<2x32xf32>, vector<32x128xf32>, vector<2x128xf32> -> vector<2x128xf32>
    %cst_76 = arith.constant dense<0.000000e+00> : vector<2x256xf32>
    %348 = tpu.matmul %346, %0, %cst_76 {dimension_numbers = #tpu.dot_dimension_numbers<[1], [0], [0], [1], [0, 0, 1, 1], [], []>} : vector<2x32xf32>, vector<32x256xf32>, vector<2x256xf32> -> vector<2x256xf32>
    %349 = vector.extract_strided_slice %348 {offsets = [0, 128], sizes = [2, 128], strides = [1, 1]} : vector<2x256xf32> to vector<2x128xf32>
    %350 = arith.addf %349, %347 : vector<2x128xf32>
    %351 = arith.addf %350, %16 : vector<2x128xf32>
    %352 = arith.negf %351 : vector<2x128xf32>
    %353 = math.exp %352 : vector<2x128xf32>
    %cst_77 = arith.constant 1.000000e+00 : f32
    %354 = vector.broadcast %cst_77 : f32 to vector<2x128xf32>
    %355 = arith.addf %354, %353 : vector<2x128xf32>
    %356 = arith.divf %354, %355 : vector<2x128xf32>
    %357 = vector.extract_strided_slice %356 {offsets = [0, 0], sizes = [2, 32], strides = [1, 1]} : vector<2x128xf32> to vector<2x32xf32>
    %358 = vector.extract_strided_slice %356 {offsets = [0, 32], sizes = [2, 32], strides = [1, 1]} : vector<2x128xf32> to vector<2x32xf32>
    %359 = vector.extract_strided_slice %356 {offsets = [0, 64], sizes = [2, 32], strides = [1, 1]} : vector<2x128xf32> to vector<2x32xf32>
    %cst_78 = arith.constant 2.000000e+00 : f32
    %360 = vector.broadcast %cst_78 : f32 to vector<2x32xf32>
    %361 = arith.mulf %360, %359 : vector<2x32xf32>
    %cst_79 = arith.constant 1.000000e+00 : f32
    %362 = vector.broadcast %cst_79 : f32 to vector<2x32xf32>
    %363 = arith.subf %361, %362 : vector<2x32xf32>
    %364 = vector.extract_strided_slice %356 {offsets = [0, 96], sizes = [2, 32], strides = [1, 1]} : vector<2x128xf32> to vector<2x32xf32>
    %365 = arith.mulf %358, %324 : vector<2x32xf32>
    %366 = arith.mulf %357, %363 : vector<2x32xf32>
    %367 = arith.addf %365, %366 : vector<2x32xf32>
    %368 = math.tanh %367 : vector<2x32xf32>
    %369 = arith.mulf %364, %368 : vector<2x32xf32>
    %c0_80 = arith.constant 0 : index
    %c0_81 = arith.constant 0 : index
    %370 = vector.load %arg3[%c0_80, %c0_81] : memref<432x128xf32, #tpu.memory_space<vmem>>, vector<32x128xf32>
    %cst_82 = arith.constant dense<0.000000e+00> : vector<2x128xf32>
    %371 = tpu.matmul %369, %370, %cst_82 {dimension_numbers = #tpu.dot_dimension_numbers<[1], [0], [0], [1], [0, 0, 1, 1], [], []>} : vector<2x32xf32>, vector<32x128xf32>, vector<2x128xf32> -> vector<2x128xf32>
    %372 = arith.addf %371, %10 : vector<2x128xf32>
    %cst_83 = arith.constant 0.000000e+00 : f32
    %373 = vector.broadcast %cst_83 : f32 to vector<2x128xf32>
    %374 = arith.maximumf %372, %373 : vector<2x128xf32>
    %c40 = arith.constant 40 : index
    %c0_84 = arith.constant 0 : index
    %375 = vector.load %arg3[%c40, %c0_84] : memref<432x128xf32, #tpu.memory_space<vmem>>, vector<128x128xf32>
    %cst_85 = arith.constant dense<0.000000e+00> : vector<2x128xf32>
    %376 = tpu.matmul %374, %375, %cst_85 {dimension_numbers = #tpu.dot_dimension_numbers<[1], [0], [0], [1], [0, 0, 1, 1], [], []>} : vector<2x128xf32>, vector<128x128xf32>, vector<2x128xf32> -> vector<2x128xf32>
    %c425 = arith.constant 425 : index
    %c0_86 = arith.constant 0 : index
    %377 = vector.load %arg3[%c425, %c0_86] : memref<432x128xf32, #tpu.memory_space<vmem>>, vector<1x128xf32>
    %378 = vector.broadcast %377 : vector<1x128xf32> to vector<2x128xf32>
    %379 = arith.addf %376, %378 : vector<2x128xf32>
    %cst_87 = arith.constant 0.000000e+00 : f32
    %380 = vector.broadcast %cst_87 : f32 to vector<2x128xf32>
    %381 = arith.maximumf %379, %380 : vector<2x128xf32>
    %c168 = arith.constant 168 : index
    %c0_88 = arith.constant 0 : index
    %382 = vector.load %arg3[%c168, %c0_88] : memref<432x128xf32, #tpu.memory_space<vmem>>, vector<128x128xf32>
    %cst_89 = arith.constant dense<0.000000e+00> : vector<2x128xf32>
    %383 = tpu.matmul %381, %382, %cst_89 {dimension_numbers = #tpu.dot_dimension_numbers<[1], [0], [0], [1], [0, 0, 1, 1], [], []>} : vector<2x128xf32>, vector<128x128xf32>, vector<2x128xf32> -> vector<2x128xf32>
    %c426 = arith.constant 426 : index
    %c0_90 = arith.constant 0 : index
    %384 = vector.load %arg3[%c426, %c0_90] : memref<432x128xf32, #tpu.memory_space<vmem>>, vector<1x128xf32>
    %385 = vector.broadcast %384 : vector<1x128xf32> to vector<2x128xf32>
    %386 = arith.addf %383, %385 : vector<2x128xf32>
    %cst_91 = arith.constant 0.000000e+00 : f32
    %387 = vector.broadcast %cst_91 : f32 to vector<2x128xf32>
    %388 = arith.maximumf %386, %387 : vector<2x128xf32>
    %c296 = arith.constant 296 : index
    %c0_92 = arith.constant 0 : index
    %389 = vector.load %arg3[%c296, %c0_92] : memref<432x128xf32, #tpu.memory_space<vmem>>, vector<128x128xf32>
    %cst_93 = arith.constant dense<0.000000e+00> : vector<2x128xf32>
    %390 = tpu.matmul %388, %389, %cst_93 {dimension_numbers = #tpu.dot_dimension_numbers<[1], [0], [0], [1], [0, 0, 1, 1], [], []>} : vector<2x128xf32>, vector<128x128xf32>, vector<2x128xf32> -> vector<2x128xf32>
    %c427 = arith.constant 427 : index
    %c0_94 = arith.constant 0 : index
    %391 = vector.load %arg3[%c427, %c0_94] : memref<432x128xf32, #tpu.memory_space<vmem>>, vector<1x128xf32>
    %392 = vector.broadcast %391 : vector<1x128xf32> to vector<2x128xf32>
    %393 = arith.addf %390, %392 : vector<2x128xf32>
    %cst_95 = arith.constant 0.000000e+00 : f32
    %394 = vector.broadcast %cst_95 : f32 to vector<2x128xf32>
    %395 = arith.maximumf %393, %394 : vector<2x128xf32>
    %396 = vector.extract_strided_slice %395 {offsets = [0, 0], sizes = [2, 4], strides = [1, 1]} : vector<2x128xf32> to vector<2x4xf32>
    %c0_96 = arith.constant 0 : index
    %c0_97 = arith.constant 0 : index
    %397 = vector.load %arg4[%c0_96, %c0_97] : memref<2x4xf32, #tpu.memory_space<vmem>>, vector<2x4xf32>
    tpu.vector_store %arg4[%c0_96, %c0_97], %396 {strides = array<i32>} : memref<2x4xf32, #tpu.memory_space<vmem>>, vector<2x4xf32>,
    return
  }
}

</mosaic_0001>

<bundles_post_ra>
// kernel: critic_forward.1
= control target key start
LH: loop header
LB: loop body
LE: loop exit
PB: predicated region body
PF: predicated region fallthrough
CT: control target
= control target key end

     0   :  { %9 = vsyncpa [#allocation3], 0  ;;  %s3383_s0 = inlined_call_operand.vmem [shape: f32[16,8], index: 0, kind: input, shape index: {}]   ;;  %s3384_s1 = inlined_call_operand.vmem [shape: f32[2,8], index: 1, kind: input, shape index: {}]   ;;  %s3385_s2 = inlined_call_operand.hbm [shape: f32[72,256], index: 2, kind: input, shape index: {}]   ;;  %s3386_s3 = inlined_call_operand.hbm [shape: f32[432,128], index: 3, kind: input, shape index: {}]   ;;  %s3387_s4 = inlined_call_operand.hbm [shape: f32[2,4], index: 4, kind: output, shape index: {}]  }
   0x1   :  { %10 = vsyncpa [#allocation6], 0 }
   0x2   :  { %11 = vsyncpa [#allocation4], 0  ;;  %s3017_s15 = smov [#allocation2]   ;;  %s2945_s19 = scalar_lea.hbm %s3385_s2, 2304 }
   0x3   :  { %s21_s16 = sshll.u32 %s3017_s15, 4  ;;  %p2946_p0 = scmp.ne.s32.totalorder %s3385_s2, %s2945_s19  ;;  %s22_s16 = int_to_ptr.vmem [resolvable:$true] %s21_s16 }
   0x4   :  { %p2949_p1 = scmp.lt.u32.totalorder %s2945_s19, %s3385_s2 }
   0x6   :  { %p2951_p2 = pnand %p2949_p1, %p2946_p0 }
   0x8   :  { %2954 = shalt.err (!%p2951_p2)
}
   0x9   :  { %s2955_s24 = scalar_lea.vmem %s22_s16, 2304  ;;  %p2960_p4 = scmp.lt.s32.totalorder %s22_s16, %s22_s16 }
   0xa   :  { %p2956_p3 = scmp.ne.s32.totalorder %s22_s16, %s2955_s24  ;;  %p2961_p5 = scmp.lt.s32.totalorder %s2955_s24, %s2955_s24 }
   0xc   :  { %p2962_p6 = por %p2961_p5, %p2960_p4 }
   0xe   :  { %p2963_p7 = pnand %p2962_p6, %p2956_p3 }
  0x10   :  { %2966 = shalt.err (!%p2963_p7)
}
  0x11   :  { %s3018_s25 = smov 256   ;;  %s3019_s26 = smov 16  }
  0x12   :  { %27 = dma.hbm_to_vmem [thread:$0]  %s3385_s2, 2304, %s22_s16, [#allocation3], %s3018_s25, %s3018_s25, %s3019_s26  }
  0x13   :  { %s3020_s29 = smov [#allocation5]   ;;  %s2967_s7 = scalar_lea.hbm %s3386_s3, 6912 }
  0x14   :  { %s33_s30 = sshll.u32 %s3020_s29, 4  ;;  %p2968_p8 = scmp.ne.s32.totalorder %s3386_s3, %s2967_s7  ;;  %s34_s30 = int_to_ptr.vmem [resolvable:$true] %s33_s30 }
  0x15   :  { %p2971_p9 = scmp.lt.u32.totalorder %s2967_s7, %s3386_s3 }
  0x17   :  { %p2973_p10 = pnand %p2971_p9, %p2968_p8 }
  0x19   :  { %2976 = shalt.err (!%p2973_p10)
}
  0x1a   :  { %s2977_s12 = scalar_lea.vmem %s34_s30, 6912  ;;  %p2982_p12 = scmp.lt.s32.totalorder %s34_s30, %s34_s30 }
  0x1b   :  { %p2978_p11 = scmp.ne.s32.totalorder %s34_s30, %s2977_s12  ;;  %p2983_p13 = scmp.lt.s32.totalorder %s2977_s12, %s2977_s12 }
  0x1d   :  { %p2984_p0 = por %p2983_p13, %p2982_p12 }
  0x1f   :  { %p2985_p1 = pnand %p2984_p0, %p2978_p11 }
  0x21   :  { %2988 = shalt.err (!%p2985_p1)
}
  0x22   :  { %s3021_s2 = smov 128   ;;  %s3022_s13 = smov 8  }
  0x23   :  { %39 = dma.hbm_to_vmem [thread:$0]  %s3386_s3, 6912, %s34_s30, [#allocation6], %s3021_s2, %s3021_s2, %s3022_s13  }
  0x24   :  { %3011 = dma.done.wait [#allocation3], 2304  }
  0x25   :  { %3012 = vsyncadd [#allocation3], 4294964992 }
  0x26   :  { %3013 = dma.done.wait [#allocation6], 6912  }
  0x27   :  { %3014 = vsyncadd [#allocation6], 4294960384  ;;  %v3023_v0 = vmov 0.0   ;;  %vm3024_vm0 = vmmov 0   ;;  %vm68_vm1 = vcmask 64512   ;;  %v62_v1 = vld [vmem:[#allocation5 + $0x20] sm:$0xff] }
  0x28   :  { %2430 = vmatprep.subr.mxu0 %v3023_v0  ;;  %2432 = vmatprep.mubr.msk.f32.mxu0 %vm3024_vm0, %v3023_v0  ;;  %v61_v2 = vld [vmem:[%s3384_s1] sm:$0x3]  ;;  %v58_v3 = vld [vmem:[#allocation2 + $0x48] sm:$0xff]  ;;  %s3026_s1 = smov 32   ;;  %v55_v23 = vld [vmem:[#allocation2 + $0x50] sm:$0xff]  ;;  %v3027_v25 = vmov 0.0|0.0  }
  0x29   :  { %605 = vmatprep.mubr.f32.mxu1 %v3023_v0  ;;  %2431 = vmatpush3.msra.mxu0 %v62_v1  ;;  %v142_v4 = vld [vmem:[%s3383_s0] sm:$0xff]  ;;  %v143_v5 = vld [vmem:[%s3383_s0 + $0x8] sm:$0xff]  ;;  %s3025_s0 = smov 64   ;;  %v57_v27 = vld [vmem:[#allocation2 + $0x70] sm:$0xff]  ;;  %vm251_vm2 = vcmask 261120   ;;  %s3028_s21 = smov [#allocation7]  }
  0x2a   :  { %2433 = vmatmul.mubr.msk.f32.vlgmr.msra.gmra.mrb[0].mxu0 %vm68_vm1, %v61_v2  ;;  %2435 = vmatprep.subr.mxu0 %v58_v3  ;;  %v59_v6 = vld [vmem:[#allocation2 + $0x80] ss:$0 sm:$0xff]  ;;  %v47_v28 = vld [vmem:[#allocation2 + $0x8] sm:$0xff]  ;;  %v49_v29 = vld [vmem:[#allocation2 + $0x18] sm:$0xff]  ;;  %s2264_s22 = sshll.u32 %s3028_s21, 4  ;;  %vm2256_vm3 = vcmask 25600   ;;  %s2265_s22 = int_to_ptr.vmem [resolvable:$true] %s2264_s22 }
  0x2b   :  { %2436 = vmatpush3.msra.mxu0 %v58_v3  ;;  %2437 = vmatprep.mubr.msk.f32.mxu0 %vm68_vm1, %v142_v4  ;;  %v54_v22 = vld [vmem:[#allocation2 + $0x40] sm:$0xff]  ;;  %v3106_v30 = vpack.c.bf16 %v49_v29, %v47_v28  ;;  %v48_v32 = vld [vmem:[#allocation2 + $0x10] sm:$0xff]  ;;  %v51_v33 = vld [vmem:[#allocation2 + $0x28] sm:$0xff]  ;;  %s2989_s23 = scalar_lea.vmem %s2265_s22, 32  ;;  %p2994_p3 = scmp.lt.s32.totalorder %s2265_s22, %s2265_s22 }
  0x2c   :  { %v56_v24 = vld [vmem:[#allocation2 + $0x60] sm:$0xff]  ;;  %2644 = vmatprep.subr.bf16.mxu0 %v3027_v25  ;;  %v3104_v26 = vpack.c.bf16 %v55_v23, %v54_v22  ;;  %v53_v36 = vld [vmem:[#allocation2 + $0x38] sm:$0xff]  ;;  %v52_v39 = vld [vmem:[#allocation2 + $0x30] sm:$0xff]  ;;  %p2990_p2 = scmp.ne.s32.totalorder %s2265_s22, %s2989_s23  ;;  %p2995_p4 = scmp.lt.s32.totalorder %s2989_s23, %s2989_s23 }
  0x2d   :  { %v46_v31 = vld [vmem:[#allocation2] sm:$0xff]  ;;  %v3109_v34 = vpack.c.bf16 %v57_v27, %v56_v24  ;;  %v3114_v37 = vpack.c.bf16 %v53_v36, %v51_v33  ;;  %2665 = vmatprep.subr.bf16.mxu1 %v3106_v30  ;;  %v3140_v49 = vld [vmem:[#allocation2 + $0x88] ss:$0 sm:$0xff] }
  0x2e   :  { %2438 = vmatmul.mubr.msk.f32.vlgmr.msra.gmra.mrb[2].mxu0 %vm68_vm1, %v143_v5  ;;  %v3111_v35 = vpack.c.bf16 %v48_v32, %v46_v31  ;;  %v50_v38 = vld [vmem:[#allocation2 + $0x20] sm:$0xff]  ;;  %p2996_p5 = por %p2995_p4, %p2994_p3 }
  0x2f   :  { %2448 = vmatprep.mubr.msk.f32.mxu0 %vm3024_vm0, %v3023_v0  ;;  %2646 = vmatpush3.bf16.msra.mxu0 %v3104_v26  ;;  %v3120_v40 = vpack.c.bf16 %v52_v39, %v50_v38 }
  0x30   :  { %2647 = vmatprep.subr.bf16.mxu0 %v3027_v25  ;;  %2667 = vmatpush1.bf16.msra.mxu1 %v3111_v35  ;;  %p2997_p6 = pnand %p2996_p5, %p2990_p2 }
  0x31   :  { %2669 = vmatprep.subr.bf16.mxu1 %v3114_v37 }
  0x33   :  { %2649 = vmatpush3.bf16.msra.mxu0 %v3109_v34 }
  0x34   :  { %2651 = vmatprep.subr.bf16.mxu0 %v3106_v30  ;;  %2671 = vmatpush1.bf16.msra.mxu1 %v3120_v40 }
  0x35   :  { %2679 = vmatprep.subr.bf16.mxu1 %v3106_v30 }
  0x36   :  { %2449 = vmatmul.mubr.f32.vlgmr.msra.gmra.mrb[4].mxu0 %v3023_v0 }
  0x37   :  { %2653 = vmatpush1.bf16.msra.mxu0 %v3111_v35  ;;  %394 = vmatprep.mubr.f32.mxu0 %v3023_v0 }
  0x38   :  { %2655 = vmatprep.subr.bf16.mxu0 %v3114_v37 }
  0x3b   :  { %2657 = vmatpush1.bf16.msra.mxu0 %v3120_v40 }
  0x3c   :  { %2658 = vmatprep.subr.bf16.mxu0 %v3027_v25 }
 0x101   :  { %v2439_v7 = vpop.f32.mrb[2].mxu0 }
 0x102   :  { %v3093_v8 = vadd.f32 %v2439_v7, %v59_v6  ;;  %v216_v9 = vpop.f32.mrb[3].mxu0 }
 0x103   :  { %v3095_v10 = vadd.f32 %v216_v9, %v59_v6 }
 0x105   :  { %v2278_v11 = vmul.f32 -1.442695, %v3095_v10 }
 0x107   :  { %2849 = vpow2.f32 %v2278_v11 }
 0x109   :  { %v321_v44 = vpop.f32.mrb[4].mxu0 }
 0x10a   :  { %v2450_v45 = vpop.f32.mrb[5].mxu0 }
 0x111   :  { %v2850_v12 = vpop.eup %2849 }
 0x112   :  { %v229_v13 = vadd.f32 1.0, %v2850_v12 }
 0x114   :  { %2851 = vrcp.f32 %v229_v13 }
 0x11e   :  { %v2852_v14 = vpop.eup %2851 }
 0x11f   :  { %v232_v15 = vmul.f32 2.0, %v2852_v14  ;;  %v234_v19 = vmul.f32 0.0, %v2852_v14 }
 0x121   :  { %v2279_v16 = vadd.f32 -1.0, %v232_v15 }
 0x123   :  { %236 = vrot.lane.b32.xlu0 %v2279_v16, %s3025_s0 }
 0x195   :  { %v237_v17 = vpop.permute.xlu0 %236 }
 0x196   :  { %v239_v18 = vmul.f32 %v2852_v14, %v237_v17 }
 0x198   :  { %241 = vrot.lane.b32.xlu0 %v239_v18, %s3026_s1 }
 0x20a   :  { %v242_v20 = vpop.permute.xlu0 %241 }
 0x20b   :  { %v3100_v21 = vadd.f32 %v242_v20, %v234_v19 }
 0x20d   :  { %2853 = vtanh.f32 %v3100_v21  ;;  %v441_v7 = vrot.slane %v3100_v21, 6 }
 0x217   :  { %v2854_v41 = vpop.eup %2853 }
 0x218   :  { %247 = vrot.lane.b32.xlu1 %v2854_v41, %s3025_s0 }
 0x28a   :  { %v248_v42 = vpop.permute.xlu1 %247 }
 0x28b   :  { %v250_v43 = vmul.f32 %v2852_v14, %v248_v42 }
 0x28d   :  { %326 = vrot.lane.b32.xlu1 %v250_v43, %s3026_s1 }
 0x2ff   :  { %v327_v46 = vpop.permute.xlu1 %326 }
 0x300   :  { %2280 = vmatmul.mubr.msk.f32.vlgmr.msra.gmra.mrb[6].mxu0 %vm251_vm2, %v327_v46 }
 0x301   :  { %2660 = vmatpush3.bf16.msra.mxu0 %v3104_v26  ;;  %2459 = vmatprep.mubr.msk.f32.mxu0 %vm3024_vm0, %v3023_v0 }
 0x302   :  { %2661 = vmatprep.subr.bf16.mxu0 %v3027_v25 }
 0x305   :  { %2663 = vmatpush3.bf16.msra.mxu0 %v3109_v34 }
 0x306   :  { %2672 = vmatprep.subr.bf16.mxu0 %v3027_v25 }
 0x3d3   :  { %v396_v47 = vpop.f32.mrb[6].mxu0 }
 0x3d4   :  { %v429_v48 = vrot.slane %v396_v47, 6  ;;  %v398_v50 = vpop.f32.mrb[7].mxu0 }
 0x3d5   :  { %v401_v51 = vadd.f32 %v398_v50, %v321_v44 }
 0x3d6   :  { %v431_v52 = vadd.f32 %v429_v48, %v3095_v10 }
 0x3d7   :  { %v402_v53 = vadd.f32 %v401_v51, %v3140_v49 }
 0x3d8   :  { %v2283_v54 = vmul.f32 -1.442695, %v431_v52 }
 0x3d9   :  { %v2281_v55 = vmul.f32 -1.442695, %v402_v53 }
 0x3da   :  { %2855 = vpow2.f32 %v2283_v54 }
 0x3db   :  { %2857 = vpow2.f32 %v2281_v55 }
 0x3e4   :  { %v2856_v56 = vpop.eup %2855 }
 0x3e5   :  { %v2858_v57 = vpop.eup %2857  ;;  %v435_v58 = vadd.f32 1.0, %v2856_v56 }
 0x3e6   :  { %v406_v59 = vadd.f32 1.0, %v2858_v57 }
 0x3e7   :  { %2859 = vrcp.f32 %v435_v58 }
 0x3e8   :  { %2861 = vrcp.f32 %v406_v59 }
 0x3f1   :  { %v2860_v60 = vpop.eup %2859 }
 0x3f2   :  { %v2862_v61 = vpop.eup %2861  ;;  %v438_v62 = vmul.f32 2.0, %v2860_v60  ;;  %v443_v9 = vmul.f32 %v2860_v60, %v441_v7 }
 0x3f3   :  { %v409_v63 = vmul.f32 2.0, %v2862_v61  ;;  %v411_v12 = vmul.f32 0.0, %v2862_v61 }
 0x3f4   :  { %v2284_v1 = vadd.f32 -1.0, %v438_v62 }
 0x3f5   :  { %v2282_v2 = vadd.f32 -1.0, %v409_v63 }
 0x3f6   :  { %445 = vrot.lane.b32.xlu0 %v2284_v1, %s3025_s0 }
 0x3f7   :  { %413 = vrot.lane.b32.xlu1 %v2282_v2, %s3025_s0 }
 0x468   :  { %v446_v3 = vpop.permute.xlu0 %445 }
 0x469   :  { %v448_v4 = vmul.f32 %v2860_v60, %v446_v3  ;;  %v414_v5 = vpop.permute.xlu1 %413 }
 0x46a   :  { %v416_v6 = vmul.f32 %v2862_v61, %v414_v5 }
 0x46b   :  { %450 = vrot.lane.b32.xlu0 %v448_v4, %s3026_s1 }
 0x46c   :  { %418 = vrot.lane.b32.xlu1 %v416_v6, %s3026_s1 }
 0x4dd   :  { %v451_v11 = vpop.permute.xlu0 %450 }
 0x4de   :  { %v3149_v13 = vadd.f32 %v451_v11, %v443_v9  ;;  %v419_v14 = vpop.permute.xlu1 %418 }
 0x4df   :  { %v3151_v15 = vadd.f32 %v419_v14, %v411_v12 }
 0x4e0   :  { %2863 = vtanh.f32 %v3149_v13  ;;  %v652_v57 = vrot.slane %v3149_v13, 6 }
 0x4e1   :  { %2865 = vtanh.f32 %v3151_v15 }
 0x4ea   :  { %v2864_v16 = vpop.eup %2863 }
 0x4eb   :  { %v2866_v17 = vpop.eup %2865  ;;  %456 = vrot.lane.b32.xlu0 %v2864_v16, %s3025_s0 }
 0x4ec   :  { %424 = vrot.lane.b32.xlu1 %v2866_v17, %s3025_s0 }
 0x55d   :  { %v457_v18 = vpop.permute.xlu0 %456 }
 0x55e   :  { %v459_v19 = vmul.f32 %v2860_v60, %v457_v18  ;;  %v425_v20 = vpop.permute.xlu1 %424 }
 0x55f   :  { %v427_v21 = vmul.f32 %v2862_v61, %v425_v20 }
 0x560   :  { %v536_v22 = vrot.slane %v459_v19, 2 }
 0x561   :  { %461 = vrot.lane.b32.xlu1 %v427_v21, %s3026_s1 }
 0x562   :  { %537 = vrot.lane.b32.xlu0 %v536_v22, %s3026_s1 }
 0x5d3   :  { %v462_v23 = vpop.permute.xlu1 %461 }
 0x5d4   :  { %v538_v24 = vpop.permute.xlu0 %537  ;;  %2460 = vmatmul.mubr.msk.f32.vlgmr.msra.gmra.mrb[8].mxu0 %vm251_vm2, %v462_v23 }
 0x5d5   :  { %2286 = vmatmul.mubr.msk.f32.vlgmr.msra.gmra.mrb[0].mxu1 %vm251_vm2, %v538_v24  ;;  %2674 = vmatpush3.bf16.msra.mxu0 %v3104_v26 }
 0x5d6   :  { %2681 = vmatpush1.bf16.msra.mxu1 %v3111_v35  ;;  %2675 = vmatprep.subr.bf16.mxu0 %v3027_v25 }
 0x5d7   :  { %2683 = vmatprep.subr.bf16.mxu1 %v3114_v37  ;;  %2470 = vmatprep.mubr.msk.f32.mxu0 %vm3024_vm0, %v3023_v0 }
 0x5d8   :  { %816 = vmatprep.mubr.f32.mxu1 %v3023_v0 }
 0x5d9   :  { %2677 = vmatpush3.bf16.msra.mxu0 %v3109_v34 }
 0x5da   :  { %2685 = vmatpush1.bf16.msra.mxu1 %v3120_v40  ;;  %2686 = vmatprep.subr.bf16.mxu0 %v3027_v25 }
 0x5db   :  { %2693 = vmatprep.subr.bf16.mxu1 %v3106_v30 }
 0x6a7   :  { %v531_v27 = vpop.f32.mrb[8].mxu0 }
 0x6a8   :  { %v2461_v28 = vpop.f32.mrb[9].mxu0  ;;  %v607_v29 = vpop.f32.mrb[0].mxu1 }
 0x6a9   :  { %v640_v31 = vrot.slane %v607_v29, 4  ;;  %v609_v32 = vpop.f32.mrb[1].mxu1 }
 0x6aa   :  { %v612_v33 = vadd.f32 %v609_v32, %v531_v27 }
 0x6ab   :  { %v642_v36 = vadd.f32 %v640_v31, %v3095_v10 }
 0x6ac   :  { %v613_v38 = vadd.f32 %v612_v33, %v3140_v49 }
 0x6ad   :  { %v2289_v39 = vmul.f32 -1.442695, %v642_v36 }
 0x6ae   :  { %v2287_v41 = vmul.f32 -1.442695, %v613_v38 }
 0x6af   :  { %2867 = vpow2.f32 %v2289_v39 }
 0x6b0   :  { %2869 = vpow2.f32 %v2287_v41 }
 0x6b9   :  { %v2868_v42 = vpop.eup %2867 }
 0x6ba   :  { %v2870_v43 = vpop.eup %2869  ;;  %v646_v44 = vadd.f32 1.0, %v2868_v42 }
 0x6bb   :  { %v617_v45 = vadd.f32 1.0, %v2870_v43 }
 0x6bc   :  { %2871 = vrcp.f32 %v646_v44 }
 0x6bd   :  { %2873 = vrcp.f32 %v617_v45 }
 0x6c6   :  { %v2872_v46 = vpop.eup %2871 }
 0x6c7   :  { %v2874_v47 = vpop.eup %2873  ;;  %v649_v48 = vmul.f32 2.0, %v2872_v46  ;;  %v654_v58 = vmul.f32 %v2872_v46, %v652_v57 }
 0x6c8   :  { %v620_v50 = vmul.f32 2.0, %v2874_v47  ;;  %v622_v60 = vmul.f32 %v2874_v47, %v3151_v15 }
 0x6c9   :  { %v2290_v51 = vadd.f32 -1.0, %v649_v48 }
 0x6ca   :  { %v2288_v52 = vadd.f32 -1.0, %v620_v50 }
 0x6cb   :  { %656 = vrot.lane.b32.xlu0 %v2290_v51, %s3025_s0 }
 0x6cc   :  { %624 = vrot.lane.b32.xlu1 %v2288_v52, %s3025_s0 }
 0x73d   :  { %v657_v53 = vpop.permute.xlu0 %656 }
 0x73e   :  { %v659_v54 = vmul.f32 %v2872_v46, %v657_v53  ;;  %v625_v55 = vpop.permute.xlu1 %624 }
 0x73f   :  { %v627_v56 = vmul.f32 %v2874_v47, %v625_v55 }
 0x740   :  { %661 = vrot.lane.b32.xlu0 %v659_v54, %s3026_s1 }
 0x741   :  { %629 = vrot.lane.b32.xlu1 %v627_v56, %s3026_s1 }
 0x7b2   :  { %v662_v59 = vpop.permute.xlu0 %661 }
 0x7b3   :  { %v3180_v61 = vadd.f32 %v662_v59, %v654_v58  ;;  %v630_v62 = vpop.permute.xlu1 %629 }
 0x7b4   :  { %v3182_v63 = vadd.f32 %v630_v62, %v622_v60 }
 0x7b5   :  { %2875 = vtanh.f32 %v3180_v61  ;;  %v863_v42 = vrot.slane %v3180_v61, 6 }
 0x7b6   :  { %2877 = vtanh.f32 %v3182_v63 }
 0x7bf   :  { %v2876_v1 = vpop.eup %2875 }
 0x7c0   :  { %v2878_v2 = vpop.eup %2877  ;;  %667 = vrot.lane.b32.xlu0 %v2876_v1, %s3025_s0 }
 0x7c1   :  { %635 = vrot.lane.b32.xlu1 %v2878_v2, %s3025_s0 }
 0x832   :  { %v668_v3 = vpop.permute.xlu0 %667 }
 0x833   :  { %v670_v4 = vmul.f32 %v2872_v46, %v668_v3  ;;  %v636_v5 = vpop.permute.xlu1 %635 }
 0x834   :  { %v638_v6 = vmul.f32 %v2874_v47, %v636_v5 }
 0x835   :  { %v747_v7 = vrot.slane %v670_v4, 4 }
 0x836   :  { %672 = vrot.lane.b32.xlu1 %v638_v6, %s3026_s1 }
 0x837   :  { %748 = vrot.lane.b32.xlu0 %v747_v7, %s3026_s1 }
 0x8a8   :  { %v673_v9 = vpop.permute.xlu1 %672 }
 0x8a9   :  { %v749_v11 = vpop.permute.xlu0 %748  ;;  %2471 = vmatmul.mubr.msk.f32.vlgmr.msra.gmra.mrb[10].mxu0 %vm251_vm2, %v673_v9 }
 0x8aa   :  { %2292 = vmatmul.mubr.msk.f32.vlgmr.msra.gmra.mrb[2].mxu1 %vm251_vm2, %v749_v11  ;;  %2688 = vmatpush3.bf16.msra.mxu0 %v3104_v26 }
 0x8ab   :  { %2695 = vmatpush1.bf16.msra.mxu1 %v3111_v35  ;;  %2689 = vmatprep.subr.bf16.mxu0 %v3027_v25 }
 0x8ac   :  { %2697 = vmatprep.subr.bf16.mxu1 %v3114_v37  ;;  %2481 = vmatprep.mubr.msk.f32.mxu0 %vm3024_vm0, %v3023_v0 }
 0x8ad   :  { %1027 = vmatprep.mubr.f32.mxu1 %v3023_v0 }
 0x8ae   :  { %2691 = vmatpush3.bf16.msra.mxu0 %v3109_v34 }
 0x8af   :  { %2699 = vmatpush1.bf16.msra.mxu1 %v3120_v40  ;;  %2700 = vmatprep.subr.bf16.mxu0 %v3027_v25 }
 0x8b0   :  { %2707 = vmatprep.subr.bf16.mxu1 %v3106_v30 }
 0x97c   :  { %v742_v12 = vpop.f32.mrb[10].mxu0 }
 0x97d   :  { %v2472_v13 = vpop.f32.mrb[11].mxu0  ;;  %v818_v14 = vpop.f32.mrb[2].mxu1 }
 0x97e   :  { %v851_v15 = vrot.slane %v818_v14, 2  ;;  %v820_v16 = vpop.f32.mrb[3].mxu1 }
 0x97f   :  { %v823_v17 = vadd.f32 %v820_v16, %v742_v12 }
 0x980   :  { %v853_v18 = vadd.f32 %v851_v15, %v3095_v10 }
 0x981   :  { %v824_v19 = vadd.f32 %v823_v17, %v3140_v49 }
 0x982   :  { %v2295_v20 = vmul.f32 -1.442695, %v853_v18 }
 0x983   :  { %v2293_v21 = vmul.f32 -1.442695, %v824_v19 }
 0x984   :  { %2879 = vpow2.f32 %v2295_v20 }
 0x985   :  { %2881 = vpow2.f32 %v2293_v21 }
 0x98e   :  { %v2880_v22 = vpop.eup %2879 }
 0x98f   :  { %v2882_v23 = vpop.eup %2881  ;;  %v857_v24 = vadd.f32 1.0, %v2880_v22 }
 0x990   :  { %v828_v27 = vadd.f32 1.0, %v2882_v23 }
 0x991   :  { %2883 = vrcp.f32 %v857_v24 }
 0x992   :  { %2885 = vrcp.f32 %v828_v27 }
 0x99b   :  { %v2884_v28 = vpop.eup %2883 }
 0x99c   :  { %v2886_v29 = vpop.eup %2885  ;;  %v860_v31 = vmul.f32 2.0, %v2884_v28  ;;  %v865_v43 = vmul.f32 %v2884_v28, %v863_v42 }
 0x99d   :  { %v831_v32 = vmul.f32 2.0, %v2886_v29  ;;  %v833_v45 = vmul.f32 %v2886_v29, %v3182_v63 }
 0x99e   :  { %v2296_v33 = vadd.f32 -1.0, %v860_v31 }
 0x99f   :  { %v2294_v36 = vadd.f32 -1.0, %v831_v32 }
 0x9a0   :  { %867 = vrot.lane.b32.xlu0 %v2296_v33, %s3025_s0 }
 0x9a1   :  { %835 = vrot.lane.b32.xlu1 %v2294_v36, %s3025_s0 }
 0xa12   :  { %v868_v10 = vpop.permute.xlu0 %867 }
 0xa13   :  { %v870_v38 = vmul.f32 %v2884_v28, %v868_v10  ;;  %v836_v39 = vpop.permute.xlu1 %835 }
 0xa14   :  { %v838_v41 = vmul.f32 %v2886_v29, %v836_v39 }
 0xa15   :  { %872 = vrot.lane.b32.xlu0 %v870_v38, %s3026_s1 }
 0xa16   :  { %840 = vrot.lane.b32.xlu1 %v838_v41, %s3026_s1 }
 0xa87   :  { %v873_v44 = vpop.permute.xlu0 %872 }
 0xa88   :  { %v3211_v46 = vadd.f32 %v873_v44, %v865_v43  ;;  %v841_v47 = vpop.permute.xlu1 %840 }
 0xa89   :  { %v3213_v48 = vadd.f32 %v841_v47, %v833_v45 }
 0xa8a   :  { %2887 = vtanh.f32 %v3211_v46  ;;  %v1071_v21 = vrot.slane %v3211_v46, 6 }
 0xa8b   :  { %2889 = vtanh.f32 %v3213_v48 }
 0xa94   :  { %v2888_v50 = vpop.eup %2887 }
 0xa95   :  { %v2890_v51 = vpop.eup %2889  ;;  %878 = vrot.lane.b32.xlu0 %v2888_v50, %s3025_s0 }
 0xa96   :  { %846 = vrot.lane.b32.xlu1 %v2890_v51, %s3025_s0 }
 0xb07   :  { %v879_v52 = vpop.permute.xlu0 %878 }
 0xb08   :  { %v881_v53 = vmul.f32 %v2884_v28, %v879_v52  ;;  %v847_v54 = vpop.permute.xlu1 %846 }
 0xb09   :  { %v849_v55 = vmul.f32 %v2886_v29, %v847_v54 }
 0xb0a   :  { %v958_v56 = vrot.slane %v881_v53, 6 }
 0xb0b   :  { %883 = vrot.lane.b32.xlu1 %v849_v55, %s3026_s1 }
 0xb0c   :  { %959 = vrot.lane.b32.xlu0 %v958_v56, %s3026_s1 }
 0xb7d   :  { %v884_v57 = vpop.permute.xlu1 %883 }
 0xb7e   :  { %v960_v58 = vpop.permute.xlu0 %959  ;;  %2482 = vmatmul.mubr.msk.f32.vlgmr.msra.gmra.mrb[12].mxu0 %vm251_vm2, %v884_v57 }
 0xb7f   :  { %2298 = vmatmul.mubr.msk.f32.vlgmr.msra.gmra.mrb[4].mxu1 %vm251_vm2, %v960_v58  ;;  %2702 = vmatpush3.bf16.msra.mxu0 %v3104_v26 }
 0xb80   :  { %2709 = vmatpush1.bf16.msra.mxu1 %v3111_v35  ;;  %1234 = vmatprep.mubr.f32.mxu1 %v3023_v0 }
 0xb81   :  { %2711 = vmatprep.subr.bf16.mxu1 %v3114_v37  ;;  %2703 = vmatprep.subr.bf16.mxu0 %v3027_v25 }
 0xb82   :  { %2492 = vmatprep.mubr.msk.f32.mxu0 %vm3024_vm0, %v3023_v0 }
 0xb83   :  { %2705 = vmatpush3.bf16.msra.mxu0 %v3109_v34 }
 0xb84   :  { %2713 = vmatpush1.bf16.msra.mxu1 %v3120_v40  ;;  %2714 = vmatprep.subr.bf16.mxu0 %v3027_v25 }
 0xb85   :  { %2721 = vmatprep.subr.bf16.mxu1 %v3106_v30 }
 0xc51   :  { %v953_v59 = vpop.f32.mrb[12].mxu0 }
 0xc52   :  { %v2483_v60 = vpop.f32.mrb[13].mxu0  ;;  %v1029_v61 = vpop.f32.mrb[4].mxu1 }
 0xc53   :  { %v1061_v62 = vadd.f32 %v1029_v61, %v3093_v8  ;;  %v1031_v63 = vpop.f32.mrb[5].mxu1 }
 0xc54   :  { %v1034_v1 = vadd.f32 %v1031_v63, %v953_v59 }
 0xc55   :  { %v2301_v2 = vmul.f32 -1.442695, %v1061_v62 }
 0xc56   :  { %v1035_v3 = vadd.f32 %v1034_v1, %v3140_v49 }
 0xc57   :  { %2891 = vpow2.f32 %v2301_v2 }
 0xc58   :  { %v2299_v4 = vmul.f32 -1.442695, %v1035_v3 }
 0xc5a   :  { %2893 = vpow2.f32 %v2299_v4 }
 0xc61   :  { %v2892_v5 = vpop.eup %2891 }
 0xc62   :  { %v1065_v6 = vadd.f32 1.0, %v2892_v5 }
 0xc64   :  { %v2894_v7 = vpop.eup %2893  ;;  %2895 = vrcp.f32 %v1065_v6 }
 0xc65   :  { %v1039_v9 = vadd.f32 1.0, %v2894_v7 }
 0xc67   :  { %2897 = vrcp.f32 %v1039_v9 }
 0xc6e   :  { %v2896_v11 = vpop.eup %2895 }
 0xc6f   :  { %v1068_v12 = vmul.f32 2.0, %v2896_v11  ;;  %v1073_v22 = vmul.f32 %v2896_v11, %v1071_v21 }
 0xc71   :  { %v2898_v13 = vpop.eup %2897  ;;  %v2302_v14 = vadd.f32 -1.0, %v1068_v12 }
 0xc72   :  { %v1042_v15 = vmul.f32 2.0, %v2898_v13  ;;  %v1044_v27 = vmul.f32 %v2898_v13, %v3213_v48 }
 0xc73   :  { %1075 = vrot.lane.b32.xlu0 %v2302_v14, %s3025_s0 }
 0xc74   :  { %v2300_v16 = vadd.f32 -1.0, %v1042_v15 }
 0xc76   :  { %1046 = vrot.lane.b32.xlu1 %v2300_v16, %s3025_s0 }
 0xce5   :  { %v1076_v17 = vpop.permute.xlu0 %1075 }
 0xce6   :  { %v1078_v18 = vmul.f32 %v2896_v11, %v1076_v17 }
 0xce8   :  { %1080 = vrot.lane.b32.xlu0 %v1078_v18, %s3026_s1  ;;  %v1047_v19 = vpop.permute.xlu1 %1046 }
 0xce9   :  { %v1049_v20 = vmul.f32 %v2898_v13, %v1047_v19 }
 0xceb   :  { %1051 = vrot.lane.b32.xlu1 %v1049_v20, %s3026_s1 }
 0xd5a   :  { %v1081_v23 = vpop.permute.xlu0 %1080 }
 0xd5b   :  { %v3241_v24 = vadd.f32 %v1081_v23, %v1073_v22 }
 0xd5d   :  { %2899 = vtanh.f32 %v3241_v24  ;;  %v1052_v28 = vpop.permute.xlu1 %1051  ;;  %v1281_v4 = vrot.slane %v3241_v24, 6 }
 0xd5e   :  { %v1054_v29 = vadd.f32 %v1052_v28, %v1044_v27 }
 0xd60   :  { %2901 = vtanh.f32 %v1054_v29 }
 0xd67   :  { %v2900_v31 = vpop.eup %2899 }
 0xd68   :  { %1086 = vrot.lane.b32.xlu0 %v2900_v31, %s3025_s0 }
 0xd6a   :  { %v2902_v32 = vpop.eup %2901 }
 0xd6b   :  { %1057 = vrot.lane.b32.xlu1 %v2902_v32, %s3025_s0 }
 0xdda   :  { %v1087_v33 = vpop.permute.xlu0 %1086 }
 0xddb   :  { %v1089_v36 = vmul.f32 %v2896_v11, %v1087_v33 }
 0xddd   :  { %1166 = vrot.lane.b32.xlu0 %v1089_v36, %s3026_s1  ;;  %v1058_v10 = vpop.permute.xlu1 %1057 }
 0xdde   :  { %v1060_v38 = vmul.f32 %v2898_v13, %v1058_v10 }
 0xde0   :  { %1091 = vrot.lane.b32.xlu1 %v1060_v38, %s3026_s1 }
 0xe4f   :  { %v1167_v39 = vpop.permute.xlu0 %1166 }
 0xe50   :  { %2304 = vmatmul.mubr.msk.f32.vlgmr.msra.gmra.mrb[6].mxu1 %vm251_vm2, %v1167_v39 }
 0xe51   :  { %2723 = vmatpush1.bf16.msra.mxu1 %v3111_v35  ;;  %1445 = vmatprep.mubr.f32.mxu1 %v3023_v0 }
 0xe52   :  { %v1092_v41 = vpop.permute.xlu1 %1091  ;;  %2725 = vmatprep.subr.bf16.mxu1 %v3114_v37 }
 0xe53   :  { %2493 = vmatmul.mubr.msk.f32.vlgmr.msra.gmra.mrb[14].mxu0 %vm251_vm2, %v1092_v41 }
 0xe54   :  { %2716 = vmatpush3.bf16.msra.mxu0 %v3104_v26  ;;  %2503 = vmatprep.mubr.msk.f32.mxu0 %vm3024_vm0, %v3023_v0 }
 0xe55   :  { %2717 = vmatprep.subr.bf16.mxu0 %v3027_v25  ;;  %2727 = vmatpush1.bf16.msra.mxu1 %v3120_v40 }
 0xe56   :  { %2735 = vmatprep.subr.bf16.mxu1 %v3106_v30 }
 0xe58   :  { %2719 = vmatpush3.bf16.msra.mxu0 %v3109_v34 }
 0xe59   :  { %2728 = vmatprep.subr.bf16.mxu0 %v3027_v25 }
 0xf23   :  { %v1236_v42 = vpop.f32.mrb[6].mxu1 }
 0xf24   :  { %v1269_v43 = vrot.slane %v1236_v42, 6  ;;  %v1238_v44 = vpop.f32.mrb[7].mxu1 }
 0xf26   :  { %v1271_v45 = vadd.f32 %v1269_v43, %v3093_v8  ;;  %v1161_v46 = vpop.f32.mrb[14].mxu0 }
 0xf27   :  { %v1241_v47 = vadd.f32 %v1238_v44, %v1161_v46  ;;  %v2494_v48 = vpop.f32.mrb[15].mxu0 }
 0xf28   :  { %v2307_v50 = vmul.f32 -1.442695, %v1271_v45 }
 0xf29   :  { %v1242_v51 = vadd.f32 %v1241_v47, %v3140_v49 }
 0xf2a   :  { %2903 = vpow2.f32 %v2307_v50 }
 0xf2b   :  { %v2305_v52 = vmul.f32 -1.442695, %v1242_v51 }
 0xf2d   :  { %2905 = vpow2.f32 %v2305_v52 }
 0xf34   :  { %v2904_v53 = vpop.eup %2903 }
 0xf35   :  { %v1275_v54 = vadd.f32 1.0, %v2904_v53 }
 0xf37   :  { %v2906_v55 = vpop.eup %2905  ;;  %2907 = vrcp.f32 %v1275_v54 }
 0xf38   :  { %v1246_v56 = vadd.f32 1.0, %v2906_v55 }
 0xf3a   :  { %2909 = vrcp.f32 %v1246_v56 }
 0xf41   :  { %v2908_v57 = vpop.eup %2907 }
 0xf42   :  { %v1278_v58 = vmul.f32 2.0, %v2908_v57  ;;  %v1283_v5 = vmul.f32 %v2908_v57, %v1281_v4 }
 0xf44   :  { %v2910_v59 = vpop.eup %2909  ;;  %v2308_v60 = vadd.f32 -1.0, %v1278_v58 }
 0xf45   :  { %v1249_v61 = vmul.f32 2.0, %v2910_v59  ;;  %v1251_v9 = vmul.f32 %v2910_v59, %v1054_v29 }
 0xf46   :  { %1285 = vrot.lane.b32.xlu0 %v2308_v60, %s3025_s0 }
 0xf47   :  { %v2306_v62 = vadd.f32 -1.0, %v1249_v61 }
 0xf49   :  { %1253 = vrot.lane.b32.xlu1 %v2306_v62, %s3025_s0 }
 0xfb8   :  { %v1286_v63 = vpop.permute.xlu0 %1285 }
 0xfb9   :  { %v1288_v1 = vmul.f32 %v2908_v57, %v1286_v63 }
 0xfbb   :  { %1290 = vrot.lane.b32.xlu0 %v1288_v1, %s3026_s1  ;;  %v1254_v2 = vpop.permute.xlu1 %1253 }
 0xfbc   :  { %v1256_v3 = vmul.f32 %v2910_v59, %v1254_v2 }
 0xfbe   :  { %1258 = vrot.lane.b32.xlu1 %v1256_v3, %s3026_s1 }
0x102d   :  { %v1291_v6 = vpop.permute.xlu0 %1290 }
0x102e   :  { %v3269_v7 = vadd.f32 %v1291_v6, %v1283_v5 }
0x1030   :  { %2911 = vtanh.f32 %v3269_v7  ;;  %v1259_v11 = vpop.permute.xlu1 %1258  ;;  %v1492_v52 = vrot.slane %v3269_v7, 6 }
0x1031   :  { %v1261_v12 = vadd.f32 %v1259_v11, %v1251_v9 }
0x1033   :  { %2913 = vtanh.f32 %v1261_v12 }
0x103a   :  { %v2912_v13 = vpop.eup %2911 }
0x103b   :  { %1296 = vrot.lane.b32.xlu0 %v2912_v13, %s3025_s0 }
0x103d   :  { %v2914_v14 = vpop.eup %2913 }
0x103e   :  { %1264 = vrot.lane.b32.xlu1 %v2914_v14, %s3025_s0 }
0x10ad   :  { %v1297_v15 = vpop.permute.xlu0 %1296 }
0x10ae   :  { %v1299_v16 = vmul.f32 %v2908_v57, %v1297_v15 }
0x10b0   :  { %v1376_v17 = vrot.slane %v1299_v16, 2  ;;  %v1265_v18 = vpop.permute.xlu1 %1264 }
0x10b1   :  { %v1267_v19 = vmul.f32 %v2910_v59, %v1265_v18 }
0x10b2   :  { %1377 = vrot.lane.b32.xlu0 %v1376_v17, %s3026_s1 }
0x10b3   :  { %1301 = vrot.lane.b32.xlu1 %v1267_v19, %s3026_s1 }
0x1124   :  { %v1378_v20 = vpop.permute.xlu0 %1377 }
0x1125   :  { %2310 = vmatmul.mubr.msk.f32.vlgmr.msra.gmra.mrb[8].mxu1 %vm251_vm2, %v1378_v20  ;;  %v1302_v21 = vpop.permute.xlu1 %1301 }
0x1126   :  { %2504 = vmatmul.mubr.msk.f32.vlgmr.msra.gmra.mrb[16].mxu0 %vm251_vm2, %v1302_v21  ;;  %2737 = vmatpush1.bf16.msra.mxu1 %v3111_v35 }
0x1127   :  { %2730 = vmatpush3.bf16.msra.mxu0 %v3104_v26  ;;  %2739 = vmatprep.subr.bf16.mxu1 %v3114_v37 }
0x1128   :  { %2731 = vmatprep.subr.bf16.mxu0 %v3027_v25  ;;  %2514 = vmatprep.mubr.msk.f32.mxu0 %vm3024_vm0, %v3023_v0 }
0x1129   :  { %1656 = vmatprep.mubr.f32.mxu1 %v3023_v0 }
0x112a   :  { %2741 = vmatpush1.bf16.msra.mxu1 %v3120_v40 }
0x112b   :  { %2733 = vmatpush3.bf16.msra.mxu0 %v3109_v34  ;;  %2749 = vmatprep.subr.bf16.mxu1 %v3106_v30 }
0x112c   :  { %2742 = vmatprep.subr.bf16.mxu0 %v3027_v25 }
0x11f8   :  { %v1447_v22 = vpop.f32.mrb[8].mxu1 }
0x11f9   :  { %v1480_v23 = vrot.slane %v1447_v22, 4  ;;  %v1371_v24 = vpop.f32.mrb[16].mxu0  ;;  %v1449_v27 = vpop.f32.mrb[9].mxu1 }
0x11fa   :  { %v1452_v28 = vadd.f32 %v1449_v27, %v1371_v24  ;;  %v2505_v29 = vpop.f32.mrb[17].mxu0 }
0x11fb   :  { %v1482_v31 = vadd.f32 %v1480_v23, %v3093_v8 }
0x11fc   :  { %v1453_v32 = vadd.f32 %v1452_v28, %v3140_v49 }
0x11fd   :  { %v2313_v33 = vmul.f32 -1.442695, %v1482_v31 }
0x11fe   :  { %v2311_v36 = vmul.f32 -1.442695, %v1453_v32 }
0x11ff   :  { %2915 = vpow2.f32 %v2313_v33 }
0x1200   :  { %2917 = vpow2.f32 %v2311_v36 }
0x1209   :  { %v2916_v10 = vpop.eup %2915 }
0x120a   :  { %v2918_v38 = vpop.eup %2917  ;;  %v1486_v39 = vadd.f32 1.0, %v2916_v10 }
0x120b   :  { %v1457_v30 = vadd.f32 1.0, %v2918_v38 }
0x120c   :  { %2919 = vrcp.f32 %v1486_v39 }
0x120d   :  { %2921 = vrcp.f32 %v1457_v30 }
0x1216   :  { %v2920_v41 = vpop.eup %2919 }
0x1217   :  { %v2922_v42 = vpop.eup %2921  ;;  %v1489_v43 = vmul.f32 2.0, %v2920_v41  ;;  %v1494_v53 = vmul.f32 %v2920_v41, %v1492_v52 }
0x1218   :  { %v1460_v44 = vmul.f32 2.0, %v2922_v42  ;;  %v1462_v55 = vmul.f32 %v2922_v42, %v1261_v12 }
0x1219   :  { %v2314_v45 = vadd.f32 -1.0, %v1489_v43 }
0x121a   :  { %v2312_v46 = vadd.f32 -1.0, %v1460_v44 }
0x121b   :  { %1496 = vrot.lane.b32.xlu0 %v2314_v45, %s3025_s0 }
0x121c   :  { %1464 = vrot.lane.b32.xlu1 %v2312_v46, %s3025_s0 }
0x128d   :  { %v1497_v47 = vpop.permute.xlu0 %1496 }
0x128e   :  { %v1499_v48 = vmul.f32 %v2920_v41, %v1497_v47  ;;  %v1465_v50 = vpop.permute.xlu1 %1464 }
0x128f   :  { %v1467_v51 = vmul.f32 %v2922_v42, %v1465_v50 }
0x1290   :  { %1501 = vrot.lane.b32.xlu0 %v1499_v48, %s3026_s1 }
0x1291   :  { %1469 = vrot.lane.b32.xlu1 %v1467_v51, %s3026_s1 }
0x1302   :  { %v1502_v54 = vpop.permute.xlu0 %1501 }
0x1303   :  { %v3296_v56 = vadd.f32 %v1502_v54, %v1494_v53  ;;  %v1470_v57 = vpop.permute.xlu1 %1469 }
0x1304   :  { %v3298_v58 = vadd.f32 %v1470_v57, %v1462_v55 }
0x1305   :  { %2923 = vtanh.f32 %v3296_v56  ;;  %v1703_v27 = vrot.slane %v3296_v56, 6 }
0x1306   :  { %2925 = vtanh.f32 %v3298_v58 }
0x130f   :  { %v2924_v59 = vpop.eup %2923 }
0x1310   :  { %v2926_v60 = vpop.eup %2925  ;;  %1507 = vrot.lane.b32.xlu0 %v2924_v59, %s3025_s0 }
0x1311   :  { %1475 = vrot.lane.b32.xlu1 %v2926_v60, %s3025_s0 }
0x1382   :  { %v1508_v61 = vpop.permute.xlu0 %1507 }
0x1383   :  { %v1510_v62 = vmul.f32 %v2920_v41, %v1508_v61  ;;  %v1476_v63 = vpop.permute.xlu1 %1475 }
0x1384   :  { %v1478_v1 = vmul.f32 %v2922_v42, %v1476_v63 }
0x1385   :  { %v1587_v2 = vrot.slane %v1510_v62, 4 }
0x1386   :  { %1512 = vrot.lane.b32.xlu1 %v1478_v1, %s3026_s1  ;;  %v1900_v1 = vld [vmem:[#allocation5] sm:$0xff] }
0x1387   :  { %1588 = vrot.lane.b32.xlu0 %v1587_v2, %s3026_s1  ;;  %v1902_v2 = vld [vmem:[#allocation5 + $0x10] sm:$0xff] }
0x13f8   :  { %v1513_v3 = vpop.permute.xlu1 %1512 }
0x13f9   :  { %v1589_v4 = vpop.permute.xlu0 %1588  ;;  %2515 = vmatmul.mubr.msk.f32.vlgmr.msra.gmra.mrb[18].mxu0 %vm251_vm2, %v1513_v3 }
0x13fa   :  { %2316 = vmatmul.mubr.msk.f32.vlgmr.msra.gmra.mrb[10].mxu1 %vm251_vm2, %v1589_v4  ;;  %2744 = vmatpush3.bf16.msra.mxu0 %v3104_v26  ;;  %v1903_v4 = vld [vmem:[#allocation5 + $0x18] sm:$0xff] }
0x13fb   :  { %2751 = vmatpush1.bf16.msra.mxu1 %v3111_v35  ;;  %2745 = vmatprep.subr.bf16.mxu0 %v3027_v25 }
0x13fc   :  { %2753 = vmatprep.subr.bf16.mxu1 %v3114_v37  ;;  %2525 = vmatprep.mubr.msk.f32.mxu0 %vm3024_vm0, %v3023_v0 }
0x13fd   :  { %1867 = vmatprep.mubr.f32.mxu1 %v3023_v0 }
0x13fe   :  { %2747 = vmatpush3.bf16.msra.mxu0 %v3109_v34 }
0x13ff   :  { %2755 = vmatpush1.bf16.msra.mxu1 %v3120_v40  ;;  %2756 = vmatprep.subr.bf16.mxu0 %v3027_v25 }
0x1400   :  { %2762 = vmatprep.subr.bf16.mxu1 %v3027_v25 }
0x14cc   :  { %v1582_v26 = vpop.f32.mrb[18].mxu0 }
0x14cd   :  { %v2516_v5 = vpop.f32.mrb[19].mxu0  ;;  %v1658_v35 = vpop.f32.mrb[10].mxu1 }
0x14ce   :  { %v1691_v6 = vrot.slane %v1658_v35, 2  ;;  %v1660_v7 = vpop.f32.mrb[11].mxu1  ;;  %v1980_v35 = vld [vmem:[#allocation5 + $0x28] sm:$0xff] }
0x14cf   :  { %v1663_v9 = vadd.f32 %v1660_v7, %v1582_v26  ;;  %v2760_v26 = vpack.c.bf16 %v1903_v4, %v1902_v2  ;;  %v1982_v7 = vld [vmem:[#allocation5 + $0x38] sm:$0xff]  ;;  %v2165_v2 = vld [vmem:[#allocation5 + $0x130] sm:$0xff] }
0x14d0   :  { %v1693_v37 = vadd.f32 %v1691_v6, %v3093_v8  ;;  %v1981_v6 = vld [vmem:[#allocation5 + $0x30] sm:$0xff] }
0x14d1   :  { %v1664_v11 = vadd.f32 %v1663_v9, %v3140_v49  ;;  %v2763_v9 = vpack.c.bf16 %v1981_v6, %v1980_v35  ;;  %v2168_v35 = vld [vmem:[#allocation5 + $0x148] sm:$0xff]  ;;  %v2169_v6 = vld [vmem:[#allocation5 + $0x150] sm:$0xff] }
0x14d2   :  { %v2319_v12 = vmul.f32 -1.442695, %v1693_v37  ;;  %v1983_v37 = vld [vmem:[#allocation5 + $0x40] sm:$0xff] }
0x14d3   :  { %v2317_v13 = vmul.f32 -1.442695, %v1664_v11  ;;  %v2766_v11 = vpack.c.bf16 %v1983_v37, %v1982_v7  ;;  %v2817_v7 = vpack.c.bf16 %v2169_v6, %v2168_v35 }
0x14d4   :  { %2927 = vpow2.f32 %v2319_v12  ;;  %v1984_v12 = vld [vmem:[#allocation5 + $0x48] sm:$0xff] }
0x14d5   :  { %2929 = vpow2.f32 %v2317_v13  ;;  %v1985_v13 = vld [vmem:[#allocation5 + $0x50] sm:$0xff] }
0x14de   :  { %v2928_v34 = vpop.eup %2927 }
0x14df   :  { %v2930_v40 = vpop.eup %2929  ;;  %v1697_v14 = vadd.f32 1.0, %v2928_v34  ;;  %v2769_v34 = vpack.c.bf16 %v1985_v13, %v1984_v12  ;;  %v2173_v12 = vld [vmem:[#allocation5 + $0x170] sm:$0xff] }
0x14e0   :  { %v1668_v15 = vadd.f32 1.0, %v2930_v40  ;;  %v1986_v40 = vld [vmem:[#allocation5 + $0x58] sm:$0xff] }
0x14e1   :  { %2931 = vrcp.f32 %v1697_v14  ;;  %v1987_v14 = vld [vmem:[#allocation5 + $0x60] sm:$0xff] }
0x14e2   :  { %2933 = vrcp.f32 %v1668_v15 }
0x14eb   :  { %v2932_v16 = vpop.eup %2931 }
0x14ec   :  { %v2934_v17 = vpop.eup %2933  ;;  %v1700_v18 = vmul.f32 2.0, %v2932_v16  ;;  %v1705_v28 = vmul.f32 %v2932_v16, %v1703_v27 }
0x14ed   :  { %v1671_v19 = vmul.f32 2.0, %v2934_v17  ;;  %v1673_v31 = vmul.f32 %v2934_v17, %v3298_v58 }
0x14ee   :  { %v2320_v20 = vadd.f32 -1.0, %v1700_v18  ;;  %v1988_v18 = vld [vmem:[#allocation5 + $0x68] sm:$0xff] }
0x14ef   :  { %v2318_v21 = vadd.f32 -1.0, %v1671_v19  ;;  %v1989_v19 = vld [vmem:[#allocation5 + $0x70] sm:$0xff] }
0x14f0   :  { %1707 = vrot.lane.b32.xlu0 %v2320_v20, %s3025_s0  ;;  %v2775_v20 = vpack.c.bf16 %v1989_v19, %v1988_v18  ;;  %v2326_v18 = vld [vmem:[#allocation5 + $0x1a9] ss:$0 sm:$0xff] }
0x14f1   :  { %1675 = vrot.lane.b32.xlu1 %v2318_v21, %s3025_s0  ;;  %v1990_v21 = vld [vmem:[#allocation5 + $0x78] sm:$0xff] }
0x1562   :  { %v1708_v8 = vpop.permute.xlu0 %1707 }
0x1563   :  { %v1710_v22 = vmul.f32 %v2932_v16, %v1708_v8  ;;  %v1676_v23 = vpop.permute.xlu1 %1675  ;;  %v1991_v8 = vld [vmem:[#allocation5 + $0x80] sm:$0xff] }
0x1564   :  { %v1678_v24 = vmul.f32 %v2934_v17, %v1676_v23  ;;  %v1992_v23 = vld [vmem:[#allocation5 + $0x88] sm:$0xff] }
0x1565   :  { %1712 = vrot.lane.b32.xlu0 %v1710_v22, %s3026_s1  ;;  %v2778_v22 = vpack.c.bf16 %v1991_v8, %v1990_v21 }
0x1566   :  { %1680 = vrot.lane.b32.xlu1 %v1678_v24, %s3026_s1  ;;  %v1993_v24 = vld [vmem:[#allocation5 + $0x90] sm:$0xff] }
0x1567   :  { %v2781_v27 = vpack.c.bf16 %v1993_v24, %v1992_v23  ;;  %v2179_v23 = vld [vmem:[#allocation5 + $0x1a0] sm:$0xff] }
0x15d7   :  { %v1713_v29 = vpop.permute.xlu0 %1712 }
0x15d8   :  { %v1715_v32 = vadd.f32 %v1713_v29, %v1705_v28  ;;  %v1681_v33 = vpop.permute.xlu1 %1680  ;;  %v1994_v29 = vld [vmem:[#allocation5 + $0x98] sm:$0xff] }
0x15d9   :  { %v1683_v36 = vadd.f32 %v1681_v33, %v1673_v31  ;;  %v1995_v31 = vld [vmem:[#allocation5 + $0xa0] sm:$0xff]  ;;  %v2072_v33 = vld [vmem:[#allocation5 + $0xa8] sm:$0xff] }
0x15da   :  { %2935 = vtanh.f32 %v1715_v32  ;;  %v2784_v32 = vpack.c.bf16 %v1995_v31, %v1994_v29 }
0x15db   :  { %2937 = vtanh.f32 %v1683_v36 }
0x15e4   :  { %v2936_v10 = vpop.eup %2935 }
0x15e5   :  { %v2938_v38 = vpop.eup %2937  ;;  %1718 = vrot.lane.b32.xlu0 %v2936_v10, %s3025_s0  ;;  %v2074_v10 = vld [vmem:[#allocation5 + $0xb8] sm:$0xff] }
0x15e6   :  { %1686 = vrot.lane.b32.xlu1 %v2938_v38, %s3025_s0 }
0x1657   :  { %v1719_v39 = vpop.permute.xlu0 %1718 }
0x1658   :  { %v1721_v30 = vmul.f32 %v2932_v16, %v1719_v39  ;;  %v1687_v41 = vpop.permute.xlu1 %1686  ;;  %v2075_v39 = vld [vmem:[#allocation5 + $0xc0] sm:$0xff] }
0x1659   :  { %v1689_v42 = vmul.f32 %v2934_v17, %v1687_v41  ;;  %v2772_v17 = vpack.c.bf16 %v1987_v14, %v1986_v40  ;;  %v2076_v41 = vld [vmem:[#allocation5 + $0xc8] sm:$0xff]  ;;  %v2175_v40 = vld [vmem:[#allocation5 + $0x180] sm:$0xff] }
0x165a   :  { %v1798_v43 = vrot.slane %v1721_v30, 6  ;;  %v2790_v30 = vpack.c.bf16 %v2075_v39, %v2074_v10 }
0x165b   :  { %1723 = vrot.lane.b32.xlu1 %v1689_v42, %s3026_s1  ;;  %v2077_v42 = vld [vmem:[#allocation5 + $0xd0] sm:$0xff] }
0x165c   :  { %1799 = vrot.lane.b32.xlu0 %v1798_v43, %s3026_s1  ;;  %v2793_v43 = vpack.c.bf16 %v2077_v42, %v2076_v41 }
0x16cd   :  { %v1724_v44 = vpop.permute.xlu1 %1723 }
0x16ce   :  { %v1800_v45 = vpop.permute.xlu0 %1799  ;;  %2526 = vmatmul.mubr.msk.f32.vlgmr.msra.gmra.mrb[20].mxu0 %vm251_vm2, %v1724_v44  ;;  %v2078_v44 = vld [vmem:[#allocation5 + $0xd8] sm:$0xff] }
0x16cf   :  { %2322 = vmatmul.mubr.msk.f32.vlgmr.msra.gmra.mrb[12].mxu1 %vm251_vm2, %v1800_v45  ;;  %2536 = vmatprep.mubr.msk.f32.mxu0 %vm3024_vm0, %v3023_v0  ;;  %v2079_v45 = vld [vmem:[#allocation5 + $0xe0] sm:$0xff] }
0x16d0   :  { %2571 = vmatprep.mubr.msk.f32.mxu1 %vm3024_vm0, %v3023_v0  ;;  %2764 = vmatpush3.bf16.msra.mxu1 %v2763_v9  ;;  %v2171_v9 = vld [vmem:[#allocation5 + $0x160] sm:$0xff] }
0x16d1   :  { %2765 = vmatprep.subr.bf16.mxu1 %v3027_v25 }
0x16d4   :  { %2767 = vmatpush3.bf16.msra.mxu1 %v2766_v11  ;;  %v2172_v11 = vld [vmem:[#allocation5 + $0x168] sm:$0xff] }
0x16d5   :  { %2768 = vmatprep.subr.bf16.mxu1 %v3027_v25  ;;  %v2823_v13 = vpack.c.bf16 %v2173_v12, %v2172_v11 }
0x16d8   :  { %2770 = vmatpush3.bf16.msra.mxu1 %v2769_v34  ;;  %v2174_v34 = vld [vmem:[#allocation5 + $0x178] sm:$0xff] }
0x16d9   :  { %2771 = vmatprep.subr.bf16.mxu1 %v3027_v25  ;;  %v2826_v14 = vpack.c.bf16 %v2175_v40, %v2174_v34 }
0x16dc   :  { %2773 = vmatpush3.bf16.msra.mxu1 %v2772_v17 }
0x16dd   :  { %2774 = vmatprep.subr.bf16.mxu1 %v3027_v25 }
0x16e0   :  { %2776 = vmatpush3.bf16.msra.mxu1 %v2775_v20 }
0x16e1   :  { %2777 = vmatprep.subr.bf16.mxu1 %v3027_v25 }
0x16e4   :  { %2779 = vmatpush3.bf16.msra.mxu1 %v2778_v22  ;;  %v2178_v22 = vld [vmem:[#allocation5 + $0x198] sm:$0xff] }
0x16e5   :  { %2780 = vmatprep.subr.bf16.mxu1 %v3027_v25  ;;  %v2832_v24 = vpack.c.bf16 %v2179_v23, %v2178_v22 }
0x16e8   :  { %2782 = vmatpush3.bf16.msra.mxu1 %v2781_v27  ;;  %v2327_v27 = vld [vmem:[#allocation5 + $0x1aa] ss:$0 sm:$0xff] }
0x16e9   :  { %2783 = vmatprep.subr.bf16.mxu1 %v3027_v25 }
0x16ec   :  { %2785 = vmatpush3.bf16.msra.mxu1 %v2784_v32 }
0x16ed   :  { %2810 = vmatprep.subr.bf16.mxu1 %v3027_v25 }
0x17a1   :  { %v1793_v46 = vpop.f32.mrb[20].mxu0 }
0x17a2   :  { %v2527_v47 = vpop.f32.mrb[21].mxu0  ;;  %v1869_v48 = vpop.f32.mrb[12].mxu1 }
0x17a3   :  { %v1870_v50 = vpop.f32.mrb[13].mxu1  ;;  %v2080_v47 = vld [vmem:[#allocation5 + $0xe8] sm:$0xff]  ;;  %v2081_v48 = vld [vmem:[#allocation5 + $0xf0] sm:$0xff] }
0x17a4   :  { %v1873_v51 = vadd.f32 %v1870_v50, %v1793_v46  ;;  %v2796_v46 = vpack.c.bf16 %v2079_v45, %v2078_v44  ;;  %v2799_v50 = vpack.c.bf16 %v2081_v48, %v2080_v47 }
0x17a6   :  { %v1874_v52 = vadd.f32 %v1873_v51, %v3140_v49  ;;  %v1901_v49 = vld [vmem:[#allocation5 + $0x8] sm:$0xff]  ;;  %v2082_v51 = vld [vmem:[#allocation5 + $0xf8] sm:$0xff] }
0x17a7   :  { %v2757_v3 = vpack.c.bf16 %v1901_v49, %v1900_v1  ;;  %v2164_v49 = vld [vmem:[#allocation5 + $0x128] sm:$0xff] }
0x17a8   :  { %v2323_v53 = vmul.f32 -1.442695, %v1874_v52  ;;  %v2083_v52 = vld [vmem:[#allocation5 + $0x100] sm:$0xff]  ;;  %v2811_v4 = vpack.c.bf16 %v2165_v2, %v2164_v49 }
0x17a9   :  { %2758 = vmatpush3.bf16.msra.mxu0 %v2757_v3  ;;  %v2166_v3 = vld [vmem:[#allocation5 + $0x138] sm:$0xff] }
0x17aa   :  { %2939 = vpow2.f32 %v2323_v53  ;;  %2759 = vmatprep.subr.bf16.mxu0 %v3027_v25  ;;  %v2802_v53 = vpack.c.bf16 %v2083_v52, %v2082_v51 }
0x17ad   :  { %2761 = vmatpush3.bf16.msra.mxu0 %v2760_v26  ;;  %v2167_v26 = vld [vmem:[#allocation5 + $0x140] sm:$0xff] }
0x17ae   :  { %2786 = vmatprep.subr.bf16.mxu0 %v3027_v25 }
0x17b4   :  { %v2940_v54 = vpop.eup %2939 }
0x17b5   :  { %v1878_v55 = vadd.f32 1.0, %v2940_v54  ;;  %v2084_v54 = vld [vmem:[#allocation5 + $0x108] sm:$0xff] }
0x17b7   :  { %2941 = vrcp.f32 %v1878_v55  ;;  %v2085_v55 = vld [vmem:[#allocation5 + $0x110] sm:$0xff] }
0x17c1   :  { %v2942_v56 = vpop.eup %2941 }
0x17c2   :  { %v1881_v57 = vmul.f32 2.0, %v2942_v56  ;;  %v1883_v61 = vmul.f32 %v2942_v56, %v1683_v36  ;;  %v2073_v36 = vld [vmem:[#allocation5 + $0xb0] sm:$0xff] }
0x17c3   :  { %v2787_v38 = vpack.c.bf16 %v2073_v36, %v2072_v33  ;;  %v2328_v33 = vld [vmem:[#allocation5 + $0x1ab] ss:$0 sm:$0xff] }
0x17c4   :  { %v2324_v58 = vadd.f32 -1.0, %v1881_v57  ;;  %v2274_v57 = vld [vmem:[#allocation5 + $0x1a8] ss:$0 sm:$0xff] }
0x17c6   :  { %1885 = vrot.lane.b32.xlu0 %v2324_v58, %s3025_s0 }
0x1838   :  { %v1886_v59 = vpop.permute.xlu0 %1885 }
0x1839   :  { %v1888_v60 = vmul.f32 %v2942_v56, %v1886_v59 }
0x183b   :  { %1890 = vrot.lane.b32.xlu1 %v1888_v60, %s3026_s1 }
0x18ad   :  { %v1891_v62 = vpop.permute.xlu1 %1890 }
0x18ae   :  { %v1893_v63 = vadd.f32 %v1891_v62, %v1883_v61  ;;  %v2086_v62 = vld [vmem:[#allocation5 + $0x118] sm:$0xff] }
0x18b0   :  { %2943 = vtanh.f32 %v1893_v63  ;;  %v2087_v63 = vld [vmem:[#allocation5 + $0x120] sm:$0xff] }
0x18b1   :  { %v2808_v1 = vpack.c.bf16 %v2087_v63, %v2086_v62 }
0x18ba   :  { %v2944_v5 = vpop.eup %2943 }
0x18bb   :  { %1896 = vrot.lane.b32.xlu0 %v2944_v5, %s3025_s0  ;;  %v2814_v5 = vpack.c.bf16 %v2167_v26, %v2166_v3 }
0x192d   :  { %v1897_v15 = vpop.permute.xlu0 %1896 }
0x192e   :  { %v1899_v16 = vmul.f32 %v2942_v56, %v1897_v15  ;;  %v2805_v56 = vpack.c.bf16 %v2085_v55, %v2084_v54  ;;  %v2176_v15 = vld [vmem:[#allocation5 + $0x188] sm:$0xff] }
0x1930   :  { %1905 = vrot.lane.b32.xlu1 %v1899_v16, %s3026_s1  ;;  %v2177_v16 = vld [vmem:[#allocation5 + $0x190] sm:$0xff] }
0x1931   :  { %v2829_v17 = vpack.c.bf16 %v2177_v16, %v2176_v15 }
0x19a2   :  { %v1906_v28 = vpop.permute.xlu1 %1905 }
0x19a3   :  { %2537 = vmatmul.mubr.msk.f32.vlgmr.msra.gmra.mrb[0].mxu0 %vm251_vm2, %v1906_v28 }
0x19a4   :  { %2606 = vmatprep.mubr.msk.f32.mxu0 %vm3024_vm0, %v3023_v0  ;;  %2788 = vmatpush3.bf16.msra.mxu0 %v2787_v38 }
0x19a5   :  { %2789 = vmatprep.subr.bf16.mxu0 %v3027_v25 }
0x19a8   :  { %2791 = vmatpush3.bf16.msra.mxu0 %v2790_v30 }
0x19a9   :  { %2792 = vmatprep.subr.bf16.mxu0 %v3027_v25 }
0x19ac   :  { %2794 = vmatpush3.bf16.msra.mxu0 %v2793_v43 }
0x19ad   :  { %2795 = vmatprep.subr.bf16.mxu0 %v3027_v25 }
0x19b0   :  { %2797 = vmatpush3.bf16.msra.mxu0 %v2796_v46 }
0x19b1   :  { %2798 = vmatprep.subr.bf16.mxu0 %v3027_v25 }
0x19b4   :  { %2800 = vmatpush3.bf16.msra.mxu0 %v2799_v50 }
0x19b5   :  { %2801 = vmatprep.subr.bf16.mxu0 %v3027_v25 }
0x19b8   :  { %2803 = vmatpush3.bf16.msra.mxu0 %v2802_v53 }
0x19b9   :  { %2804 = vmatprep.subr.bf16.mxu0 %v3027_v25 }
0x19bc   :  { %2806 = vmatpush3.bf16.msra.mxu0 %v2805_v56 }
0x19bd   :  { %2807 = vmatprep.subr.bf16.mxu0 %v3027_v25 }
0x19c0   :  { %2809 = vmatpush3.bf16.msra.mxu0 %v2808_v1 }
0x1a76   :  { %v1975_v58 = vpop.f32.mrb[0].mxu0 }
0x1a77   :  { %v2834_v59 = vadd.f32 %v2274_v57, %v1975_v58  ;;  %v2538_v60 = vpop.f32.mrb[1].mxu0 }
0x1a79   :  { %v1979_v61 = vmax.f32 %v2834_v59, 0.0 }
0x1a7b   :  { %2572 = vmatmul.mubr.f32.vlgmr.msra.gmra.mrb[14].mxu1 %v1979_v61 }
0x1a7c   :  { %2641 = vmatprep.mubr.msk.f32.mxu1 %vm3024_vm0, %v3023_v0  ;;  %2812 = vmatpush3.bf16.msra.mxu1 %v2811_v4  ;;  %v2170_v0 = vld [vmem:[#allocation5 + $0x158] sm:$0xff] }
0x1a7d   :  { %2813 = vmatprep.subr.bf16.mxu1 %v3027_v25  ;;  %v2820_v37 = vpack.c.bf16 %v2171_v9, %v2170_v0 }
0x1a80   :  { %2815 = vmatpush3.bf16.msra.mxu1 %v2814_v5 }
0x1a81   :  { %2816 = vmatprep.subr.bf16.mxu1 %v3027_v25 }
0x1a84   :  { %2818 = vmatpush3.bf16.msra.mxu1 %v2817_v7 }
0x1a85   :  { %2819 = vmatprep.subr.bf16.mxu1 %v3027_v25 }
0x1a88   :  { %2821 = vmatpush3.bf16.msra.mxu1 %v2820_v37 }
0x1a89   :  { %2822 = vmatprep.subr.bf16.mxu1 %v3027_v25 }
0x1a8c   :  { %2824 = vmatpush3.bf16.msra.mxu1 %v2823_v13 }
0x1a8d   :  { %2825 = vmatprep.subr.bf16.mxu1 %v3027_v25 }
0x1a90   :  { %2827 = vmatpush3.bf16.msra.mxu1 %v2826_v14 }
0x1a91   :  { %2828 = vmatprep.subr.bf16.mxu1 %v3027_v25 }
0x1a94   :  { %2830 = vmatpush3.bf16.msra.mxu1 %v2829_v17 }
0x1a95   :  { %2831 = vmatprep.subr.bf16.mxu1 %v3027_v25 }
0x1a98   :  { %2833 = vmatpush3.bf16.msra.mxu1 %v2832_v24 }
0x1b4e   :  { %v2067_v19 = vpop.f32.mrb[14].mxu1 }
0x1b4f   :  { %v2068_v20 = vadd.f32 %v2326_v18, %v2067_v19  ;;  %v2573_v21 = vpop.f32.mrb[15].mxu1 }
0x1b51   :  { %v2071_v8 = vmax.f32 %v2068_v20, 0.0 }
0x1b53   :  { %2607 = vmatmul.mubr.f32.vlgmr.msra.gmra.mrb[22].mxu0 %v2071_v8 }
0x1c26   :  { %v2159_v28 = vpop.f32.mrb[22].mxu0 }
0x1c27   :  { %v2160_v29 = vadd.f32 %v2327_v27, %v2159_v28  ;;  %v2608_v31 = vpop.f32.mrb[23].mxu0 }
0x1c29   :  { %v2163_v32 = vmax.f32 %v2160_v29, 0.0 }
0x1c2b   :  { %2642 = vmatmul.mubr.f32.vlgmr.msra.gmra.mrb[16].mxu1 %v2163_v32 }
0x1cfe   :  { %v2251_v36 = vpop.f32.mrb[16].mxu1 }
0x1cff   :  { %v2252_v25 = vadd.f32 %v2328_v33, %v2251_v36  ;;  %v2643_v10 = vpop.f32.mrb[17].mxu1 }
0x1d01   :  { %v2255_v38 = vmax.f32 %v2252_v25, 0.0 }
0x1d03   :  { %2257 = vst.msk [vmem:[#allocation7] sm:$0x3] %vm2256_vm3, %v2255_v38 }
0x1d04   :  { %3000 = shalt.err (!%p2997_p6)
}
0x1d05   :  { %s3001_s26 = scalar_lea.hbm %s3387_s4, 32 }
0x1d06   :  { %p3002_p7 = scmp.ne.s32.totalorder %s3387_s4, %s3001_s26  ;;  %p3005_p8 = scmp.lt.u32.totalorder %s3001_s26, %s3387_s4 }
0x1d08   :  { %p3007_p9 = pnand %p3005_p8, %p3002_p7 }
0x1d0a   :  { %3010 = shalt.err (!%p3007_p9)
}
0x1d0b   :  { %2267 = dma.vmem_to_hbm [thread:$0]  %s2265_s22, 32, %s3387_s4, [#allocation4]  }
0x1d0c   :  { %3015 = dma.done.wait [#allocation4], 32  }
0x1d0d   :  { %3016 = vsyncadd [#allocation4], 4294967264 }
0x1d0e   :  { %2271 = vsyncpa [#allocation3], 1 }
0x1d0f   :  { %2272 = vsyncpa [#allocation6], 1 }
0x1d10   :  { %2273 = vsyncpa [#allocation4], 1 }

</bundles_post_ra>
